<compile_context>
chip_gen: v7x
topology: tpu7x:2x2x1
jax: 0.10.0
libtpu: 0.0.40
codegen_flags: <defaults>
</compile_context>

<pallas_src>
import functools

import jax
import jax.numpy as jnp
from jax import lax
from jax.experimental import pallas as pl
from jax.experimental.pallas import tpu as pltpu

_OUT_PAD = 128  # lane-dense padded width of the 2-class head output


def _sigmoid(x):
    # One EUP op (tanh) instead of exp + reciprocal.
    return 0.5 * jnp.tanh(0.5 * x) + 0.5


# --------------------------------------------------------------------------- #
# Fused kernel: per-chunk input projection + biLSTM recurrence, head on last chunk.
# --------------------------------------------------------------------------- #
def _text_lstm_kernel(xf_ref, xr_ref, wihf_ref, wihb_ref, whhf_ref, whhb_ref,
                      bf_ref, bb_ref, wlin_ref, blin_ref, out_ref,
                      xgf_scr, xgb_scr, hf_scr, cf_scr, hb_scr, cb_scr,
                      *, chunk_t, batch_p, hidden):
    TC, Bp, H = chunk_t, batch_p, hidden
    c_idx = pl.program_id(0)
    n_chunks = pl.num_programs(0)

    @pl.when(c_idx == 0)
    def _init():
        hf_scr[...] = jnp.zeros_like(hf_scr)
        cf_scr[...] = jnp.zeros_like(cf_scr)
        hb_scr[...] = jnp.zeros_like(hb_scr)
        cb_scr[...] = jnp.zeros_like(cb_scr)

    # Chunk input projections: one MXU matmul per direction over TC*Bp rows
    # (bf16 operands, f32 accumulation), staged to VMEM scratch so the serial
    # recurrence only pulls one [Bp, 4H] row block per step.
    xf = xf_ref[...].reshape(TC * Bp, -1)
    xgf_scr[...] = (jnp.dot(xf, wihf_ref[...], preferred_element_type=jnp.float32)
                    + bf_ref[...]).reshape(TC, Bp, 4 * H)
    xr = xr_ref[...].reshape(TC * Bp, -1)
    xgb_scr[...] = (jnp.dot(xr, wihb_ref[...], preferred_element_type=jnp.float32)
                    + bb_ref[...]).reshape(TC, Bp, 4 * H)

    whh_f = whhf_ref[...]
    whh_b = whhb_ref[...]

    def lstm_cell(xg_row, h, c, whh):
        gates = xg_row + jnp.dot(h.astype(jnp.bfloat16), whh,
                                 preferred_element_type=jnp.float32)   # [Bp, 4H]
        sig = _sigmoid(gates[:, :3 * H])          # gate layout (i, f, o, g)
        g = jnp.tanh(gates[:, 3 * H:])
        i = sig[:, :H]
        f = sig[:, H:2 * H]
        o = sig[:, 2 * H:3 * H]
        c_new = f * c + i * g
        h_new = o * jnp.tanh(c_new)
        return h_new, c_new

    def step(s, carry):
        h_f, c_f, h_b, c_b = carry
        # Forward direction: local step s of chunk c  -> global time c*TC + s.
        # Reverse direction: local step TC-1-s of the mirrored chunk (n_chunks-1-c)
        #                    -> global time T-1-(c*TC+s), preserving nn.LSTM h_n semantics.
        h_f, c_f = lstm_cell(xgf_scr[s], h_f, c_f, whh_f)
        h_b, c_b = lstm_cell(xgb_scr[TC - 1 - s], h_b, c_b, whh_b)
        return h_f, c_f, h_b, c_b

    carry0 = (hf_scr[...], cf_scr[...], hb_scr[...], cb_scr[...])
    h_f, c_f, h_b, c_b = lax.fori_loop(0, TC, step, carry0, unroll=min(TC, 4))

    hf_scr[...] = h_f
    cf_scr[...] = c_f
    hb_scr[...] = h_b
    cb_scr[...] = c_b

    @pl.when(c_idx == n_chunks - 1)
    def _head():
        # torch.cat([h_n[0], h_n[1]], dim=1) -> relu -> dropout(identity) -> linear.
        h = jnp.concatenate([h_f, h_b], axis=-1)
        hr = jnp.maximum(h, 0.0)
        out_ref[...] = jnp.dot(hr.astype(jnp.bfloat16), wlin_ref[...],
                               preferred_element_type=jnp.float32) + blin_ref[...]


# --------------------------------------------------------------------------- #
# Weight preparation (plain JAX, runs once under jit/XLA)
# --------------------------------------------------------------------------- #
def _permute_gate_cols(w):
    """[..., 4H] in PyTorch gate order (i, f, g, o) -> kernel order (i, f, o, g)."""
    i, f, g, o = jnp.split(w, 4, axis=-1)
    return jnp.concatenate([i, f, o, g], axis=-1)


def text_lstm_forward(x, w_ih, w_hh, b_ih, b_hh, w_lin, b_lin, *, time_chunk=64):
    B, T, D = x.shape
    H = w_hh.shape[-1]
    Bp = max(8, ((B + 7) // 8) * 8)        # pad batch (sublane dim) to a multiple of 8

    # Largest chunk <= time_chunk that divides T (production path would pad/mask T).
    tc = min(time_chunk, T)
    while T % tc:
        tc -= 1
    n_chunks = T // tc

    # Time-major, batch-padded, bf16 activations for the MXU.
    x_tm = jnp.transpose(x, (1, 0, 2))
    x_tm = jnp.pad(x_tm, ((0, 0), (0, Bp - B), (0, 0))).astype(jnp.bfloat16)

    wih_f = _permute_gate_cols(w_ih[0].T).astype(jnp.bfloat16)        # [D, 4H]
    wih_b = _permute_gate_cols(w_ih[1].T).astype(jnp.bfloat16)
    whh_f = _permute_gate_cols(w_hh[0].T).astype(jnp.bfloat16)        # [H, 4H]
    whh_b = _permute_gate_cols(w_hh[1].T).astype(jnp.bfloat16)
    b_f = _permute_gate_cols(b_ih[0] + b_hh[0])[None, :].astype(jnp.float32)   # [1, 4H]
    b_b = _permute_gate_cols(b_ih[1] + b_hh[1])[None, :].astype(jnp.float32)

    # Lane-dense classifier head: pad the 2-wide output to 128 lanes, slice outside.
    wlin_p = jnp.zeros((2 * H, _OUT_PAD), jnp.bfloat16).at[:, :2].set(
        w_lin.T.astype(jnp.bfloat16))
    blin_p = jnp.zeros((1, _OUT_PAD), jnp.float32).at[0, :2].set(b_lin)

    def full(a):
        return pl.BlockSpec(a.shape, lambda c, nd=a.ndim: (0,) * nd)

    kernel = functools.partial(_text_lstm_kernel, chunk_t=tc, batch_p=Bp, hidden=H)
    out_p = pl.pallas_call(
        kernel,
        out_shape=jax.ShapeDtypeStruct((Bp, _OUT_PAD), jnp.float32),
        grid_spec=pltpu.PrefetchScalarGridSpec(
            num_scalar_prefetch=0,
            grid=(n_chunks,),
            in_specs=[
                # forward chunk c and mirrored chunk n_chunks-1-c of the SAME x array.
                pl.BlockSpec((tc, Bp, D), lambda c: (c, 0, 0)),
                pl.BlockSpec((tc, Bp, D), lambda c: (n_chunks - 1 - c, 0, 0)),
                full(wih_f), full(wih_b), full(whh_f), full(whh_b),
                full(b_f), full(b_b), full(wlin_p), full(blin_p),
            ],
            out_specs=pl.BlockSpec((Bp, _OUT_PAD), lambda c: (0, 0)),
            scratch_shapes=[
                pltpu.VMEM((tc, Bp, 4 * H), jnp.float32),   # xg forward chunk
                pltpu.VMEM((tc, Bp, 4 * H), jnp.float32),   # xg reverse chunk
                pltpu.VMEM((Bp, H), jnp.float32),           # h_fwd carry
                pltpu.VMEM((Bp, H), jnp.float32),           # c_fwd carry
                pltpu.VMEM((Bp, H), jnp.float32),           # h_bwd carry
                pltpu.VMEM((Bp, H), jnp.float32),           # c_bwd carry
            ]),
        compiler_params=pltpu.CompilerParams(
            dimension_semantics=("arbitrary",),
            vmem_limit_bytes=48 * 1024 * 1024),
    )(x_tm, x_tm, wih_f, wih_b, whh_f, whh_b, b_f, b_b, wlin_p, blin_p)
    return out_p[:B, :2]


# --------------------------------------------------------------------------- #
# Pure-JAX f32 reference (PyTorch semantics) for the correctness check
# --------------------------------------------------------------------------- #
def text_lstm_reference(x, w_ih, w_hh, b_ih, b_hh, w_lin, b_lin):
    B, T, D = x.shape
    H = w_hh.shape[-1]

    def run_dir(d, xs):
        wih, whh, b = w_ih[d], w_hh[d], b_ih[d] + b_hh[d]

        def step(carry, x_t):
            h, c = carry
            gates = x_t @ wih.T + h @ whh.T + b
            i = jax.nn.sigmoid(gates[:, :H])
            f = jax.nn.sigmoid(gates[:, H:2 * H])
            g = jnp.tanh(gates[:, 2 * H:3 * H])
            o = jax.nn.sigmoid(gates[:, 3 * H:])
            c = f * c + i * g
            h = o * jnp.tanh(c)
            return (h, c), None

        h0 = jnp.zeros((B, H), jnp.float32)
        (h, _), _ = lax.scan(step, (h0, h0), xs)
        return h

    x_tm = jnp.transpose(x, (1, 0, 2))
    h_fwd = run_dir(0, x_tm)
    h_bwd = run_dir(1, x_tm[::-1])
    h = jnp.maximum(jnp.concatenate([h_fwd, h_bwd], axis=1), 0.0)
    return h @ w_lin.T + b_lin


if __name__ == "__main__":
    # Small shapes: batch=2, seq=8, vector_size=32, channels (hidden) = 32.
    B, T, D, H = 2, 8, 32, 32
    key = jax.random.PRNGKey(0)
    ks = jax.random.split(key, 8)
    k_scale = 1.0 / jnp.sqrt(H)

    def u(k, shape):
        return jax.random.uniform(k, shape, jnp.float32, -k_scale, k_scale)

    # ELMo-embedded input stand-in.
    x = jax.random.normal(ks[0], (B, T, D), jnp.float32)

    # nn.LSTM params (gate order i,f,g,o); index 0 = forward dir, 1 = reverse dir.
    w_ih = u(ks[1], (2, 4 * H, D))
    w_hh = u(ks[2], (2, 4 * H, H))
    b_ih = u(ks[3], (2, 4 * H))
    b_hh = u(ks[4], (2, 4 * H))
    # nn.Linear(2*channels, 2)
    w_lin = u(ks[5], (2, 2 * H))
    b_lin = u(ks[6], (2,))

    out = text_lstm_forward(x, w_ih, w_hh, b_ih, b_hh, w_lin, b_lin, time_chunk=4)
    out = jax.block_until_ready(out)
    assert out.shape == (B, 2)

    ref = text_lstm_reference(x, w_ih, w_hh, b_ih, b_hh, w_lin, b_lin)
    # bf16 MXU operands vs f32 reference -> slightly loosened tolerance.
    assert jnp.allclose(out, ref, rtol=3e-2, atol=3e-2), (out, ref)
    print("KERNEL_OK")
</pallas_src>

<mosaic_0001>
module attributes {stable_mosaic.version = 11 : i64} {
  func.func @_text_lstm_kernel(%arg0: i32, %arg1: memref<4x8x32xbf16, #tpu.memory_space<vmem>>, %arg2: memref<4x8x32xbf16, #tpu.memory_space<vmem>>, %arg3: memref<32x128xbf16, #tpu.memory_space<vmem>>, %arg4: memref<32x128xbf16, #tpu.memory_space<vmem>>, %arg5: memref<32x128xbf16, #tpu.memory_space<vmem>>, %arg6: memref<32x128xbf16, #tpu.memory_space<vmem>>, %arg7: memref<1x128xf32, #tpu.memory_space<vmem>>, %arg8: memref<1x128xf32, #tpu.memory_space<vmem>>, %arg9: memref<64x128xbf16, #tpu.memory_space<vmem>>, %arg10: memref<1x128xf32, #tpu.memory_space<vmem>>, %arg11: memref<8x128xf32, #tpu.memory_space<vmem>>, %arg12: memref<4x8x128xf32, #tpu.memory_space<vmem>>, %arg13: memref<4x8x128xf32, #tpu.memory_space<vmem>>, %arg14: memref<8x32xf32, #tpu.memory_space<vmem>>, %arg15: memref<8x32xf32, #tpu.memory_space<vmem>>, %arg16: memref<8x32xf32, #tpu.memory_space<vmem>>, %arg17: memref<8x32xf32, #tpu.memory_space<vmem>>) attributes {dimension_semantics = [#tpu.dimension_semantics<arbitrary>], iteration_bounds = array<i64: 2>, scalar_prefetch = 0 : i64, scratch_operands = 6 : i64, tpu.core_type = #tpu.core_type<tc>, window_params = [{transform_indices = @transform_0, window_bounds = array<i64: 4, 8, 32>}, {transform_indices = @transform_1, window_bounds = array<i64: 4, 8, 32>}, {pipeline_mode = #tpu.pipeline_mode<synchronous>, transform_indices = @transform_2, window_bounds = array<i64: 32, 128>}, {pipeline_mode = #tpu.pipeline_mode<synchronous>, transform_indices = @transform_3, window_bounds = array<i64: 32, 128>}, {pipeline_mode = #tpu.pipeline_mode<synchronous>, transform_indices = @transform_4, window_bounds = array<i64: 32, 128>}, {pipeline_mode = #tpu.pipeline_mode<synchronous>, transform_indices = @transform_5, window_bounds = array<i64: 32, 128>}, {pipeline_mode = #tpu.pipeline_mode<synchronous>, transform_indices = @transform_6, window_bounds = array<i64: 1, 128>}, {pipeline_mode = #tpu.pipeline_mode<synchronous>, transform_indices = @transform_7, window_bounds = array<i64: 1, 128>}, {pipeline_mode = #tpu.pipeline_mode<synchronous>, transform_indices = @transform_8, window_bounds = array<i64: 64, 128>}, {pipeline_mode = #tpu.pipeline_mode<synchronous>, transform_indices = @transform_9, window_bounds = array<i64: 1, 128>}, {pipeline_mode = #tpu.pipeline_mode<synchronous>, transform_indices = @transform_10, window_bounds = array<i64: 8, 128>}]} {
    %c0_i32 = arith.constant 0 : i32
    %0 = arith.cmpi eq, %arg0, %c0_i32 : i32
    %1 = arith.extui %0 : i1 to i32
    %c0_i32_0 = arith.constant 0 : i32
    %2 = arith.cmpi ne, %1, %c0_i32_0 : i32
    scf.if %2 {
      %cst_96 = arith.constant 0.000000e+00 : f32
      %230 = vector.broadcast %cst_96 : f32 to vector<8x32xf32>
      %c0_97 = arith.constant 0 : index
      %c0_98 = arith.constant 0 : index
      %231 = vector.load %arg14[%c0_97, %c0_98] : memref<8x32xf32, #tpu.memory_space<vmem>>, vector<8x32xf32>
      tpu.vector_store %arg14[%c0_97, %c0_98], %230 {strides = array<i32>} : memref<8x32xf32, #tpu.memory_space<vmem>>, vector<8x32xf32>,
      %cst_99 = arith.constant 0.000000e+00 : f32
      %232 = vector.broadcast %cst_99 : f32 to vector<8x32xf32>
      %c0_100 = arith.constant 0 : index
      %c0_101 = arith.constant 0 : index
      %233 = vector.load %arg15[%c0_100, %c0_101] : memref<8x32xf32, #tpu.memory_space<vmem>>, vector<8x32xf32>
      tpu.vector_store %arg15[%c0_100, %c0_101], %232 {strides = array<i32>} : memref<8x32xf32, #tpu.memory_space<vmem>>, vector<8x32xf32>,
      %cst_102 = arith.constant 0.000000e+00 : f32
      %234 = vector.broadcast %cst_102 : f32 to vector<8x32xf32>
      %c0_103 = arith.constant 0 : index
      %c0_104 = arith.constant 0 : index
      %235 = vector.load %arg16[%c0_103, %c0_104] : memref<8x32xf32, #tpu.memory_space<vmem>>, vector<8x32xf32>
      tpu.vector_store %arg16[%c0_103, %c0_104], %234 {strides = array<i32>} : memref<8x32xf32, #tpu.memory_space<vmem>>, vector<8x32xf32>,
      %cst_105 = arith.constant 0.000000e+00 : f32
      %236 = vector.broadcast %cst_105 : f32 to vector<8x32xf32>
      %c0_106 = arith.constant 0 : index
      %c0_107 = arith.constant 0 : index
      %237 = vector.load %arg17[%c0_106, %c0_107] : memref<8x32xf32, #tpu.memory_space<vmem>>, vector<8x32xf32>
      tpu.vector_store %arg17[%c0_106, %c0_107], %236 {strides = array<i32>} : memref<8x32xf32, #tpu.memory_space<vmem>>, vector<8x32xf32>,
    } else {
    }
    %c0 = arith.constant 0 : index
    %c0_1 = arith.constant 0 : index
    %c0_2 = arith.constant 0 : index
    %3 = vector.load %arg1[%c0, %c0_1, %c0_2] : memref<4x8x32xbf16, #tpu.memory_space<vmem>>, vector<4x8x32xbf16>
    %4 = vector.shape_cast %3 : vector<4x8x32xbf16> to vector<32x32xbf16>
    %c0_3 = arith.constant 0 : index
    %c0_4 = arith.constant 0 : index
    %5 = vector.load %arg3[%c0_3, %c0_4] : memref<32x128xbf16, #tpu.memory_space<vmem>>, vector<32x128xbf16>
    %cst = arith.constant dense<0.000000e+00> : vector<32x128xf32>
    %6 = tpu.matmul %4, %5, %cst {dimension_numbers = #tpu.dot_dimension_numbers<[1], [0], [0], [1], [0, 0, 1, 1], [], []>} : vector<32x32xbf16>, vector<32x128xbf16>, vector<32x128xf32> -> vector<32x128xf32>
    %c0_5 = arith.constant 0 : index
    %c0_6 = arith.constant 0 : index
    %7 = vector.load %arg7[%c0_5, %c0_6] : memref<1x128xf32, #tpu.memory_space<vmem>>, vector<1x128xf32>
    %8 = vector.broadcast %7 : vector<1x128xf32> to vector<32x128xf32>
    %9 = arith.addf %6, %8 : vector<32x128xf32>
    %10 = vector.shape_cast %9 : vector<32x128xf32> to vector<4x8x128xf32>
    %c0_7 = arith.constant 0 : index
    %c0_8 = arith.constant 0 : index
    %c0_9 = arith.constant 0 : index
    %11 = vector.load %arg12[%c0_7, %c0_8, %c0_9] : memref<4x8x128xf32, #tpu.memory_space<vmem>>, vector<4x8x128xf32>
    tpu.vector_store %arg12[%c0_7, %c0_8, %c0_9], %10 {strides = array<i32>} : memref<4x8x128xf32, #tpu.memory_space<vmem>>, vector<4x8x128xf32>,
    %c0_10 = arith.constant 0 : index
    %c0_11 = arith.constant 0 : index
    %c0_12 = arith.constant 0 : index
    %12 = vector.load %arg2[%c0_10, %c0_11, %c0_12] : memref<4x8x32xbf16, #tpu.memory_space<vmem>>, vector<4x8x32xbf16>
    %13 = vector.shape_cast %12 : vector<4x8x32xbf16> to vector<32x32xbf16>
    %c0_13 = arith.constant 0 : index
    %c0_14 = arith.constant 0 : index
    %14 = vector.load %arg4[%c0_13, %c0_14] : memref<32x128xbf16, #tpu.memory_space<vmem>>, vector<32x128xbf16>
    %cst_15 = arith.constant dense<0.000000e+00> : vector<32x128xf32>
    %15 = tpu.matmul %13, %14, %cst_15 {dimension_numbers = #tpu.dot_dimension_numbers<[1], [0], [0], [1], [0, 0, 1, 1], [], []>} : vector<32x32xbf16>, vector<32x128xbf16>, vector<32x128xf32> -> vector<32x128xf32>
    %c0_16 = arith.constant 0 : index
    %c0_17 = arith.constant 0 : index
    %16 = vector.load %arg8[%c0_16, %c0_17] : memref<1x128xf32, #tpu.memory_space<vmem>>, vector<1x128xf32>
    %17 = vector.broadcast %16 : vector<1x128xf32> to vector<32x128xf32>
    %18 = arith.addf %15, %17 : vector<32x128xf32>
    %19 = vector.shape_cast %18 : vector<32x128xf32> to vector<4x8x128xf32>
    %c0_18 = arith.constant 0 : index
    %c0_19 = arith.constant 0 : index
    %c0_20 = arith.constant 0 : index
    %20 = vector.load %arg13[%c0_18, %c0_19, %c0_20] : memref<4x8x128xf32, #tpu.memory_space<vmem>>, vector<4x8x128xf32>
    tpu.vector_store %arg13[%c0_18, %c0_19, %c0_20], %19 {strides = array<i32>} : memref<4x8x128xf32, #tpu.memory_space<vmem>>, vector<4x8x128xf32>,
    %c0_21 = arith.constant 0 : index
    %c0_22 = arith.constant 0 : index
    %21 = vector.load %arg5[%c0_21, %c0_22] : memref<32x128xbf16, #tpu.memory_space<vmem>>, vector<32x128xbf16>
    %c0_23 = arith.constant 0 : index
    %c0_24 = arith.constant 0 : index
    %22 = vector.load %arg6[%c0_23, %c0_24] : memref<32x128xbf16, #tpu.memory_space<vmem>>, vector<32x128xbf16>
    %c0_25 = arith.constant 0 : index
    %c0_26 = arith.constant 0 : index
    %23 = vector.load %arg14[%c0_25, %c0_26] : memref<8x32xf32, #tpu.memory_space<vmem>>, vector<8x32xf32>
    %c0_27 = arith.constant 0 : index
    %c0_28 = arith.constant 0 : index
    %24 = vector.load %arg15[%c0_27, %c0_28] : memref<8x32xf32, #tpu.memory_space<vmem>>, vector<8x32xf32>
    %c0_29 = arith.constant 0 : index
    %c0_30 = arith.constant 0 : index
    %25 = vector.load %arg16[%c0_29, %c0_30] : memref<8x32xf32, #tpu.memory_space<vmem>>, vector<8x32xf32>
    %c0_31 = arith.constant 0 : index
    %c0_32 = arith.constant 0 : index
    %26 = vector.load %arg17[%c0_31, %c0_32] : memref<8x32xf32, #tpu.memory_space<vmem>>, vector<8x32xf32>
    %c0_i32_33 = arith.constant 0 : i32
    %27 = arith.index_cast %c0_i32_33 : i32 to index
    %c0_34 = arith.constant 0 : index
    %c0_35 = arith.constant 0 : index
    %28 = vector.load %arg12[%27, %c0_34, %c0_35] : memref<4x8x128xf32, #tpu.memory_space<vmem>>, vector<1x8x128xf32>
    %29 = vector.shape_cast %28 : vector<1x8x128xf32> to vector<8x128xf32>
    %30 = arith.truncf %23 : vector<8x32xf32> to vector<8x32xbf16>
    %cst_36 = arith.constant dense<0.000000e+00> : vector<8x128xf32>
    %31 = tpu.matmul %30, %21, %cst_36 {dimension_numbers = #tpu.dot_dimension_numbers<[1], [0], [0], [1], [0, 0, 1, 1], [], []>} : vector<8x32xbf16>, vector<32x128xbf16>, vector<8x128xf32> -> vector<8x128xf32>
    %32 = arith.addf %29, %31 : vector<8x128xf32>
    %33 = vector.extract_strided_slice %32 {offsets = [0, 0], sizes = [8, 96], strides = [1, 1]} : vector<8x128xf32> to vector<8x96xf32>
    %cst_37 = arith.constant 5.000000e-01 : f32
    %34 = vector.broadcast %cst_37 : f32 to vector<8x96xf32>
    %35 = arith.mulf %34, %33 : vector<8x96xf32>
    %36 = math.tanh %35 : vector<8x96xf32>
    %cst_38 = arith.constant 5.000000e-01 : f32
    %37 = vector.broadcast %cst_38 : f32 to vector<8x96xf32>
    %38 = arith.mulf %37, %36 : vector<8x96xf32>
    %cst_39 = arith.constant 5.000000e-01 : f32
    %39 = vector.broadcast %cst_39 : f32 to vector<8x96xf32>
    %40 = arith.addf %38, %39 : vector<8x96xf32>
    %41 = vector.extract_strided_slice %32 {offsets = [0, 96], sizes = [8, 32], strides = [1, 1]} : vector<8x128xf32> to vector<8x32xf32>
    %42 = math.tanh %41 : vector<8x32xf32>
    %43 = vector.extract_strided_slice %40 {offsets = [0, 0], sizes = [8, 32], strides = [1, 1]} : vector<8x96xf32> to vector<8x32xf32>
    %44 = vector.extract_strided_slice %40 {offsets = [0, 32], sizes = [8, 32], strides = [1, 1]} : vector<8x96xf32> to vector<8x32xf32>
    %45 = vector.extract_strided_slice %40 {offsets = [0, 64], sizes = [8, 32], strides = [1, 1]} : vector<8x96xf32> to vector<8x32xf32>
    %46 = arith.mulf %44, %24 : vector<8x32xf32>
    %47 = arith.mulf %43, %42 : vector<8x32xf32>
    %48 = arith.addf %46, %47 : vector<8x32xf32>
    %49 = math.tanh %48 : vector<8x32xf32>
    %50 = arith.mulf %45, %49 : vector<8x32xf32>
    %c3_i32 = arith.constant 3 : i32
    %51 = arith.subi %c3_i32, %c0_i32_33 : i32
    %52 = arith.index_cast %51 : i32 to index
    %c0_40 = arith.constant 0 : index
    %c0_41 = arith.constant 0 : index
    %53 = vector.load %arg13[%52, %c0_40, %c0_41] : memref<4x8x128xf32, #tpu.memory_space<vmem>>, vector<1x8x128xf32>
    %54 = vector.shape_cast %53 : vector<1x8x128xf32> to vector<8x128xf32>
    %55 = arith.truncf %25 : vector<8x32xf32> to vector<8x32xbf16>
    %cst_42 = arith.constant dense<0.000000e+00> : vector<8x128xf32>
    %56 = tpu.matmul %55, %22, %cst_42 {dimension_numbers = #tpu.dot_dimension_numbers<[1], [0], [0], [1], [0, 0, 1, 1], [], []>} : vector<8x32xbf16>, vector<32x128xbf16>, vector<8x128xf32> -> vector<8x128xf32>
    %57 = arith.addf %54, %56 : vector<8x128xf32>
    %58 = vector.extract_strided_slice %57 {offsets = [0, 0], sizes = [8, 96], strides = [1, 1]} : vector<8x128xf32> to vector<8x96xf32>
    %cst_43 = arith.constant 5.000000e-01 : f32
    %59 = vector.broadcast %cst_43 : f32 to vector<8x96xf32>
    %60 = arith.mulf %59, %58 : vector<8x96xf32>
    %61 = math.tanh %60 : vector<8x96xf32>
    %cst_44 = arith.constant 5.000000e-01 : f32
    %62 = vector.broadcast %cst_44 : f32 to vector<8x96xf32>
    %63 = arith.mulf %62, %61 : vector<8x96xf32>
    %cst_45 = arith.constant 5.000000e-01 : f32
    %64 = vector.broadcast %cst_45 : f32 to vector<8x96xf32>
    %65 = arith.addf %63, %64 : vector<8x96xf32>
    %66 = vector.extract_strided_slice %57 {offsets = [0, 96], sizes = [8, 32], strides = [1, 1]} : vector<8x128xf32> to vector<8x32xf32>
    %67 = math.tanh %66 : vector<8x32xf32>
    %68 = vector.extract_strided_slice %65 {offsets = [0, 0], sizes = [8, 32], strides = [1, 1]} : vector<8x96xf32> to vector<8x32xf32>
    %69 = vector.extract_strided_slice %65 {offsets = [0, 32], sizes = [8, 32], strides = [1, 1]} : vector<8x96xf32> to vector<8x32xf32>
    %70 = vector.extract_strided_slice %65 {offsets = [0, 64], sizes = [8, 32], strides = [1, 1]} : vector<8x96xf32> to vector<8x32xf32>
    %71 = arith.mulf %69, %26 : vector<8x32xf32>
    %72 = arith.mulf %68, %67 : vector<8x32xf32>
    %73 = arith.addf %71, %72 : vector<8x32xf32>
    %74 = math.tanh %73 : vector<8x32xf32>
    %75 = arith.mulf %70, %74 : vector<8x32xf32>
    %c1_i32 = arith.constant 1 : i32
    %76 = arith.index_cast %c1_i32 : i32 to index
    %c0_46 = arith.constant 0 : index
    %c0_47 = arith.constant 0 : index
    %77 = vector.load %arg12[%76, %c0_46, %c0_47] : memref<4x8x128xf32, #tpu.memory_space<vmem>>, vector<1x8x128xf32>
    %78 = vector.shape_cast %77 : vector<1x8x128xf32> to vector<8x128xf32>
    %79 = arith.truncf %50 : vector<8x32xf32> to vector<8x32xbf16>
    %cst_48 = arith.constant dense<0.000000e+00> : vector<8x128xf32>
    %80 = tpu.matmul %79, %21, %cst_48 {dimension_numbers = #tpu.dot_dimension_numbers<[1], [0], [0], [1], [0, 0, 1, 1], [], []>} : vector<8x32xbf16>, vector<32x128xbf16>, vector<8x128xf32> -> vector<8x128xf32>
    %81 = arith.addf %78, %80 : vector<8x128xf32>
    %82 = vector.extract_strided_slice %81 {offsets = [0, 0], sizes = [8, 96], strides = [1, 1]} : vector<8x128xf32> to vector<8x96xf32>
    %cst_49 = arith.constant 5.000000e-01 : f32
    %83 = vector.broadcast %cst_49 : f32 to vector<8x96xf32>
    %84 = arith.mulf %83, %82 : vector<8x96xf32>
    %85 = math.tanh %84 : vector<8x96xf32>
    %cst_50 = arith.constant 5.000000e-01 : f32
    %86 = vector.broadcast %cst_50 : f32 to vector<8x96xf32>
    %87 = arith.mulf %86, %85 : vector<8x96xf32>
    %cst_51 = arith.constant 5.000000e-01 : f32
    %88 = vector.broadcast %cst_51 : f32 to vector<8x96xf32>
    %89 = arith.addf %87, %88 : vector<8x96xf32>
    %90 = vector.extract_strided_slice %81 {offsets = [0, 96], sizes = [8, 32], strides = [1, 1]} : vector<8x128xf32> to vector<8x32xf32>
    %91 = math.tanh %90 : vector<8x32xf32>
    %92 = vector.extract_strided_slice %89 {offsets = [0, 0], sizes = [8, 32], strides = [1, 1]} : vector<8x96xf32> to vector<8x32xf32>
    %93 = vector.extract_strided_slice %89 {offsets = [0, 32], sizes = [8, 32], strides = [1, 1]} : vector<8x96xf32> to vector<8x32xf32>
    %94 = vector.extract_strided_slice %89 {offsets = [0, 64], sizes = [8, 32], strides = [1, 1]} : vector<8x96xf32> to vector<8x32xf32>
    %95 = arith.mulf %93, %48 : vector<8x32xf32>
    %96 = arith.mulf %92, %91 : vector<8x32xf32>
    %97 = arith.addf %95, %96 : vector<8x32xf32>
    %98 = math.tanh %97 : vector<8x32xf32>
    %99 = arith.mulf %94, %98 : vector<8x32xf32>
    %c3_i32_52 = arith.constant 3 : i32
    %100 = arith.subi %c3_i32_52, %c1_i32 : i32
    %101 = arith.index_cast %100 : i32 to index
    %c0_53 = arith.constant 0 : index
    %c0_54 = arith.constant 0 : index
    %102 = vector.load %arg13[%101, %c0_53, %c0_54] : memref<4x8x128xf32, #tpu.memory_space<vmem>>, vector<1x8x128xf32>
    %103 = vector.shape_cast %102 : vector<1x8x128xf32> to vector<8x128xf32>
    %104 = arith.truncf %75 : vector<8x32xf32> to vector<8x32xbf16>
    %cst_55 = arith.constant dense<0.000000e+00> : vector<8x128xf32>
    %105 = tpu.matmul %104, %22, %cst_55 {dimension_numbers = #tpu.dot_dimension_numbers<[1], [0], [0], [1], [0, 0, 1, 1], [], []>} : vector<8x32xbf16>, vector<32x128xbf16>, vector<8x128xf32> -> vector<8x128xf32>
    %106 = arith.addf %103, %105 : vector<8x128xf32>
    %107 = vector.extract_strided_slice %106 {offsets = [0, 0], sizes = [8, 96], strides = [1, 1]} : vector<8x128xf32> to vector<8x96xf32>
    %cst_56 = arith.constant 5.000000e-01 : f32
    %108 = vector.broadcast %cst_56 : f32 to vector<8x96xf32>
    %109 = arith.mulf %108, %107 : vector<8x96xf32>
    %110 = math.tanh %109 : vector<8x96xf32>
    %cst_57 = arith.constant 5.000000e-01 : f32
    %111 = vector.broadcast %cst_57 : f32 to vector<8x96xf32>
    %112 = arith.mulf %111, %110 : vector<8x96xf32>
    %cst_58 = arith.constant 5.000000e-01 : f32
    %113 = vector.broadcast %cst_58 : f32 to vector<8x96xf32>
    %114 = arith.addf %112, %113 : vector<8x96xf32>
    %115 = vector.extract_strided_slice %106 {offsets = [0, 96], sizes = [8, 32], strides = [1, 1]} : vector<8x128xf32> to vector<8x32xf32>
    %116 = math.tanh %115 : vector<8x32xf32>
    %117 = vector.extract_strided_slice %114 {offsets = [0, 0], sizes = [8, 32], strides = [1, 1]} : vector<8x96xf32> to vector<8x32xf32>
    %118 = vector.extract_strided_slice %114 {offsets = [0, 32], sizes = [8, 32], strides = [1, 1]} : vector<8x96xf32> to vector<8x32xf32>
    %119 = vector.extract_strided_slice %114 {offsets = [0, 64], sizes = [8, 32], strides = [1, 1]} : vector<8x96xf32> to vector<8x32xf32>
    %120 = arith.mulf %118, %73 : vector<8x32xf32>
    %121 = arith.mulf %117, %116 : vector<8x32xf32>
    %122 = arith.addf %120, %121 : vector<8x32xf32>
    %123 = math.tanh %122 : vector<8x32xf32>
    %124 = arith.mulf %119, %123 : vector<8x32xf32>
    %c2_i32 = arith.constant 2 : i32
    %125 = arith.index_cast %c2_i32 : i32 to index
    %c0_59 = arith.constant 0 : index
    %c0_60 = arith.constant 0 : index
    %126 = vector.load %arg12[%125, %c0_59, %c0_60] : memref<4x8x128xf32, #tpu.memory_space<vmem>>, vector<1x8x128xf32>
    %127 = vector.shape_cast %126 : vector<1x8x128xf32> to vector<8x128xf32>
    %128 = arith.truncf %99 : vector<8x32xf32> to vector<8x32xbf16>
    %cst_61 = arith.constant dense<0.000000e+00> : vector<8x128xf32>
    %129 = tpu.matmul %128, %21, %cst_61 {dimension_numbers = #tpu.dot_dimension_numbers<[1], [0], [0], [1], [0, 0, 1, 1], [], []>} : vector<8x32xbf16>, vector<32x128xbf16>, vector<8x128xf32> -> vector<8x128xf32>
    %130 = arith.addf %127, %129 : vector<8x128xf32>
    %131 = vector.extract_strided_slice %130 {offsets = [0, 0], sizes = [8, 96], strides = [1, 1]} : vector<8x128xf32> to vector<8x96xf32>
    %cst_62 = arith.constant 5.000000e-01 : f32
    %132 = vector.broadcast %cst_62 : f32 to vector<8x96xf32>
    %133 = arith.mulf %132, %131 : vector<8x96xf32>
    %134 = math.tanh %133 : vector<8x96xf32>
    %cst_63 = arith.constant 5.000000e-01 : f32
    %135 = vector.broadcast %cst_63 : f32 to vector<8x96xf32>
    %136 = arith.mulf %135, %134 : vector<8x96xf32>
    %cst_64 = arith.constant 5.000000e-01 : f32
    %137 = vector.broadcast %cst_64 : f32 to vector<8x96xf32>
    %138 = arith.addf %136, %137 : vector<8x96xf32>
    %139 = vector.extract_strided_slice %130 {offsets = [0, 96], sizes = [8, 32], strides = [1, 1]} : vector<8x128xf32> to vector<8x32xf32>
    %140 = math.tanh %139 : vector<8x32xf32>
    %141 = vector.extract_strided_slice %138 {offsets = [0, 0], sizes = [8, 32], strides = [1, 1]} : vector<8x96xf32> to vector<8x32xf32>
    %142 = vector.extract_strided_slice %138 {offsets = [0, 32], sizes = [8, 32], strides = [1, 1]} : vector<8x96xf32> to vector<8x32xf32>
    %143 = vector.extract_strided_slice %138 {offsets = [0, 64], sizes = [8, 32], strides = [1, 1]} : vector<8x96xf32> to vector<8x32xf32>
    %144 = arith.mulf %142, %97 : vector<8x32xf32>
    %145 = arith.mulf %141, %140 : vector<8x32xf32>
    %146 = arith.addf %144, %145 : vector<8x32xf32>
    %147 = math.tanh %146 : vector<8x32xf32>
    %148 = arith.mulf %143, %147 : vector<8x32xf32>
    %c3_i32_65 = arith.constant 3 : i32
    %149 = arith.subi %c3_i32_65, %c2_i32 : i32
    %150 = arith.index_cast %149 : i32 to index
    %c0_66 = arith.constant 0 : index
    %c0_67 = arith.constant 0 : index
    %151 = vector.load %arg13[%150, %c0_66, %c0_67] : memref<4x8x128xf32, #tpu.memory_space<vmem>>, vector<1x8x128xf32>
    %152 = vector.shape_cast %151 : vector<1x8x128xf32> to vector<8x128xf32>
    %153 = arith.truncf %124 : vector<8x32xf32> to vector<8x32xbf16>
    %cst_68 = arith.constant dense<0.000000e+00> : vector<8x128xf32>
    %154 = tpu.matmul %153, %22, %cst_68 {dimension_numbers = #tpu.dot_dimension_numbers<[1], [0], [0], [1], [0, 0, 1, 1], [], []>} : vector<8x32xbf16>, vector<32x128xbf16>, vector<8x128xf32> -> vector<8x128xf32>
    %155 = arith.addf %152, %154 : vector<8x128xf32>
    %156 = vector.extract_strided_slice %155 {offsets = [0, 0], sizes = [8, 96], strides = [1, 1]} : vector<8x128xf32> to vector<8x96xf32>
    %cst_69 = arith.constant 5.000000e-01 : f32
    %157 = vector.broadcast %cst_69 : f32 to vector<8x96xf32>
    %158 = arith.mulf %157, %156 : vector<8x96xf32>
    %159 = math.tanh %158 : vector<8x96xf32>
    %cst_70 = arith.constant 5.000000e-01 : f32
    %160 = vector.broadcast %cst_70 : f32 to vector<8x96xf32>
    %161 = arith.mulf %160, %159 : vector<8x96xf32>
    %cst_71 = arith.constant 5.000000e-01 : f32
    %162 = vector.broadcast %cst_71 : f32 to vector<8x96xf32>
    %163 = arith.addf %161, %162 : vector<8x96xf32>
    %164 = vector.extract_strided_slice %155 {offsets = [0, 96], sizes = [8, 32], strides = [1, 1]} : vector<8x128xf32> to vector<8x32xf32>
    %165 = math.tanh %164 : vector<8x32xf32>
    %166 = vector.extract_strided_slice %163 {offsets = [0, 0], sizes = [8, 32], strides = [1, 1]} : vector<8x96xf32> to vector<8x32xf32>
    %167 = vector.extract_strided_slice %163 {offsets = [0, 32], sizes = [8, 32], strides = [1, 1]} : vector<8x96xf32> to vector<8x32xf32>
    %168 = vector.extract_strided_slice %163 {offsets = [0, 64], sizes = [8, 32], strides = [1, 1]} : vector<8x96xf32> to vector<8x32xf32>
    %169 = arith.mulf %167, %122 : vector<8x32xf32>
    %170 = arith.mulf %166, %165 : vector<8x32xf32>
    %171 = arith.addf %169, %170 : vector<8x32xf32>
    %172 = math.tanh %171 : vector<8x32xf32>
    %173 = arith.mulf %168, %172 : vector<8x32xf32>
    %c3_i32_72 = arith.constant 3 : i32
    %174 = arith.index_cast %c3_i32_72 : i32 to index
    %c0_73 = arith.constant 0 : index
    %c0_74 = arith.constant 0 : index
    %175 = vector.load %arg12[%174, %c0_73, %c0_74] : memref<4x8x128xf32, #tpu.memory_space<vmem>>, vector<1x8x128xf32>
    %176 = vector.shape_cast %175 : vector<1x8x128xf32> to vector<8x128xf32>
    %177 = arith.truncf %148 : vector<8x32xf32> to vector<8x32xbf16>
    %cst_75 = arith.constant dense<0.000000e+00> : vector<8x128xf32>
    %178 = tpu.matmul %177, %21, %cst_75 {dimension_numbers = #tpu.dot_dimension_numbers<[1], [0], [0], [1], [0, 0, 1, 1], [], []>} : vector<8x32xbf16>, vector<32x128xbf16>, vector<8x128xf32> -> vector<8x128xf32>
    %179 = arith.addf %176, %178 : vector<8x128xf32>
    %180 = vector.extract_strided_slice %179 {offsets = [0, 0], sizes = [8, 96], strides = [1, 1]} : vector<8x128xf32> to vector<8x96xf32>
    %cst_76 = arith.constant 5.000000e-01 : f32
    %181 = vector.broadcast %cst_76 : f32 to vector<8x96xf32>
    %182 = arith.mulf %181, %180 : vector<8x96xf32>
    %183 = math.tanh %182 : vector<8x96xf32>
    %cst_77 = arith.constant 5.000000e-01 : f32
    %184 = vector.broadcast %cst_77 : f32 to vector<8x96xf32>
    %185 = arith.mulf %184, %183 : vector<8x96xf32>
    %cst_78 = arith.constant 5.000000e-01 : f32
    %186 = vector.broadcast %cst_78 : f32 to vector<8x96xf32>
    %187 = arith.addf %185, %186 : vector<8x96xf32>
    %188 = vector.extract_strided_slice %179 {offsets = [0, 96], sizes = [8, 32], strides = [1, 1]} : vector<8x128xf32> to vector<8x32xf32>
    %189 = math.tanh %188 : vector<8x32xf32>
    %190 = vector.extract_strided_slice %187 {offsets = [0, 0], sizes = [8, 32], strides = [1, 1]} : vector<8x96xf32> to vector<8x32xf32>
    %191 = vector.extract_strided_slice %187 {offsets = [0, 32], sizes = [8, 32], strides = [1, 1]} : vector<8x96xf32> to vector<8x32xf32>
    %192 = vector.extract_strided_slice %187 {offsets = [0, 64], sizes = [8, 32], strides = [1, 1]} : vector<8x96xf32> to vector<8x32xf32>
    %193 = arith.mulf %191, %146 : vector<8x32xf32>
    %194 = arith.mulf %190, %189 : vector<8x32xf32>
    %195 = arith.addf %193, %194 : vector<8x32xf32>
    %196 = math.tanh %195 : vector<8x32xf32>
    %197 = arith.mulf %192, %196 : vector<8x32xf32>
    %c3_i32_79 = arith.constant 3 : i32
    %198 = arith.subi %c3_i32_79, %c3_i32_72 : i32
    %199 = arith.index_cast %198 : i32 to index
    %c0_80 = arith.constant 0 : index
    %c0_81 = arith.constant 0 : index
    %200 = vector.load %arg13[%199, %c0_80, %c0_81] : memref<4x8x128xf32, #tpu.memory_space<vmem>>, vector<1x8x128xf32>
    %201 = vector.shape_cast %200 : vector<1x8x128xf32> to vector<8x128xf32>
    %202 = arith.truncf %173 : vector<8x32xf32> to vector<8x32xbf16>
    %cst_82 = arith.constant dense<0.000000e+00> : vector<8x128xf32>
    %203 = tpu.matmul %202, %22, %cst_82 {dimension_numbers = #tpu.dot_dimension_numbers<[1], [0], [0], [1], [0, 0, 1, 1], [], []>} : vector<8x32xbf16>, vector<32x128xbf16>, vector<8x128xf32> -> vector<8x128xf32>
    %204 = arith.addf %201, %203 : vector<8x128xf32>
    %205 = vector.extract_strided_slice %204 {offsets = [0, 0], sizes = [8, 96], strides = [1, 1]} : vector<8x128xf32> to vector<8x96xf32>
    %cst_83 = arith.constant 5.000000e-01 : f32
    %206 = vector.broadcast %cst_83 : f32 to vector<8x96xf32>
    %207 = arith.mulf %206, %205 : vector<8x96xf32>
    %208 = math.tanh %207 : vector<8x96xf32>
    %cst_84 = arith.constant 5.000000e-01 : f32
    %209 = vector.broadcast %cst_84 : f32 to vector<8x96xf32>
    %210 = arith.mulf %209, %208 : vector<8x96xf32>
    %cst_85 = arith.constant 5.000000e-01 : f32
    %211 = vector.broadcast %cst_85 : f32 to vector<8x96xf32>
    %212 = arith.addf %210, %211 : vector<8x96xf32>
    %213 = vector.extract_strided_slice %204 {offsets = [0, 96], sizes = [8, 32], strides = [1, 1]} : vector<8x128xf32> to vector<8x32xf32>
    %214 = math.tanh %213 : vector<8x32xf32>
    %215 = vector.extract_strided_slice %212 {offsets = [0, 0], sizes = [8, 32], strides = [1, 1]} : vector<8x96xf32> to vector<8x32xf32>
    %216 = vector.extract_strided_slice %212 {offsets = [0, 32], sizes = [8, 32], strides = [1, 1]} : vector<8x96xf32> to vector<8x32xf32>
    %217 = vector.extract_strided_slice %212 {offsets = [0, 64], sizes = [8, 32], strides = [1, 1]} : vector<8x96xf32> to vector<8x32xf32>
    %218 = arith.mulf %216, %171 : vector<8x32xf32>
    %219 = arith.mulf %215, %214 : vector<8x32xf32>
    %220 = arith.addf %218, %219 : vector<8x32xf32>
    %221 = math.tanh %220 : vector<8x32xf32>
    %222 = arith.mulf %217, %221 : vector<8x32xf32>
    %c4_i32 = arith.constant 4 : i32
    %c0_86 = arith.constant 0 : index
    %c0_87 = arith.constant 0 : index
    %223 = vector.load %arg14[%c0_86, %c0_87] : memref<8x32xf32, #tpu.memory_space<vmem>>, vector<8x32xf32>
    tpu.vector_store %arg14[%c0_86, %c0_87], %197 {strides = array<i32>} : memref<8x32xf32, #tpu.memory_space<vmem>>, vector<8x32xf32>,
    %c0_88 = arith.constant 0 : index
    %c0_89 = arith.constant 0 : index
    %224 = vector.load %arg15[%c0_88, %c0_89] : memref<8x32xf32, #tpu.memory_space<vmem>>, vector<8x32xf32>
    tpu.vector_store %arg15[%c0_88, %c0_89], %195 {strides = array<i32>} : memref<8x32xf32, #tpu.memory_space<vmem>>, vector<8x32xf32>,
    %c0_90 = arith.constant 0 : index
    %c0_91 = arith.constant 0 : index
    %225 = vector.load %arg16[%c0_90, %c0_91] : memref<8x32xf32, #tpu.memory_space<vmem>>, vector<8x32xf32>
    tpu.vector_store %arg16[%c0_90, %c0_91], %222 {strides = array<i32>} : memref<8x32xf32, #tpu.memory_space<vmem>>, vector<8x32xf32>,
    %c0_92 = arith.constant 0 : index
    %c0_93 = arith.constant 0 : index
    %226 = vector.load %arg17[%c0_92, %c0_93] : memref<8x32xf32, #tpu.memory_space<vmem>>, vector<8x32xf32>
    tpu.vector_store %arg17[%c0_92, %c0_93], %220 {strides = array<i32>} : memref<8x32xf32, #tpu.memory_space<vmem>>, vector<8x32xf32>,
    %c1_i32_94 = arith.constant 1 : i32
    %227 = arith.cmpi eq, %arg0, %c1_i32_94 : i32
    %228 = arith.extui %227 : i1 to i32
    %c0_i32_95 = arith.constant 0 : i32
    %229 = arith.cmpi ne, %228, %c0_i32_95 : i32
    scf.if %229 {
      %230 = tpu.concatenate %197, %222 in 1 : vector<8x32xf32>, vector<8x32xf32> -> vector<8x64xf32>
      %cst_96 = arith.constant 0.000000e+00 : f32
      %231 = vector.broadcast %cst_96 : f32 to vector<8x64xf32>
      %232 = arith.maximumf %230, %231 : vector<8x64xf32>
      %233 = arith.truncf %232 : vector<8x64xf32> to vector<8x64xbf16>
      %c0_97 = arith.constant 0 : index
      %c0_98 = arith.constant 0 : index
      %234 = vector.load %arg9[%c0_97, %c0_98] : memref<64x128xbf16, #tpu.memory_space<vmem>>, vector<64x128xbf16>
      %cst_99 = arith.constant dense<0.000000e+00> : vector<8x128xf32>
      %235 = tpu.matmul %233, %234, %cst_99 {dimension_numbers = #tpu.dot_dimension_numbers<[1], [0], [0], [1], [0, 0, 1, 1], [], []>} : vector<8x64xbf16>, vector<64x128xbf16>, vector<8x128xf32> -> vector<8x128xf32>
      %c0_100 = arith.constant 0 : index
      %c0_101 = arith.constant 0 : index
      %236 = vector.load %arg10[%c0_100, %c0_101] : memref<1x128xf32, #tpu.memory_space<vmem>>, vector<1x128xf32>
      %237 = vector.broadcast %236 : vector<1x128xf32> to vector<8x128xf32>
      %238 = arith.addf %235, %237 : vector<8x128xf32>
      %c0_102 = arith.constant 0 : index
      %c0_103 = arith.constant 0 : index
      %239 = vector.load %arg11[%c0_102, %c0_103] : memref<8x128xf32, #tpu.memory_space<vmem>>, vector<8x128xf32>
      tpu.vector_store %arg11[%c0_102, %c0_103], %238 {strides = array<i32>} : memref<8x128xf32, #tpu.memory_space<vmem>>, vector<8x128xf32>,
    } else {
    }
    return
  }
  func.func @transform_0(%arg0: i32) -> (i32, i32, i32) {
    %c0_i32 = arith.constant 0 : i32
    %c0_i32_0 = arith.constant 0 : i32
    %c0_i32_1 = arith.constant 0 : i32
    return %arg0, %c0_i32, %c0_i32_0 : i32, i32, i32
  }
  func.func @transform_1(%arg0: i32) -> (i32, i32, i32) {
    %c1_i32 = arith.constant 1 : i32
    %0 = arith.subi %c1_i32, %arg0 : i32
    %c0_i32 = arith.constant 0 : i32
    %c0_i32_0 = arith.constant 0 : i32
    %c0_i32_1 = arith.constant 0 : i32
    return %0, %c0_i32, %c0_i32_0 : i32, i32, i32
  }
  func.func @transform_2(%arg0: i32) -> (i32, i32) {
    %c0_i32 = arith.constant 0 : i32
    %c0_i32_0 = arith.constant 0 : i32
    %c0_i32_1 = arith.constant 0 : i32
    return %c0_i32, %c0_i32_0 : i32, i32
  }
  func.func @transform_3(%arg0: i32) -> (i32, i32) {
    %c0_i32 = arith.constant 0 : i32
    %c0_i32_0 = arith.constant 0 : i32
    %c0_i32_1 = arith.constant 0 : i32
    return %c0_i32, %c0_i32_0 : i32, i32
  }
  func.func @transform_4(%arg0: i32) -> (i32, i32) {
    %c0_i32 = arith.constant 0 : i32
    %c0_i32_0 = arith.constant 0 : i32
    %c0_i32_1 = arith.constant 0 : i32
    return %c0_i32, %c0_i32_0 : i32, i32
  }
  func.func @transform_5(%arg0: i32) -> (i32, i32) {
    %c0_i32 = arith.constant 0 : i32
    %c0_i32_0 = arith.constant 0 : i32
    %c0_i32_1 = arith.constant 0 : i32
    return %c0_i32, %c0_i32_0 : i32, i32
  }
  func.func @transform_6(%arg0: i32) -> (i32, i32) {
    %c0_i32 = arith.constant 0 : i32
    %c0_i32_0 = arith.constant 0 : i32
    %c0_i32_1 = arith.constant 0 : i32
    return %c0_i32, %c0_i32_0 : i32, i32
  }
  func.func @transform_7(%arg0: i32) -> (i32, i32) {
    %c0_i32 = arith.constant 0 : i32
    %c0_i32_0 = arith.constant 0 : i32
    %c0_i32_1 = arith.constant 0 : i32
    return %c0_i32, %c0_i32_0 : i32, i32
  }
  func.func @transform_8(%arg0: i32) -> (i32, i32) {
    %c0_i32 = arith.constant 0 : i32
    %c0_i32_0 = arith.constant 0 : i32
    %c0_i32_1 = arith.constant 0 : i32
    return %c0_i32, %c0_i32_0 : i32, i32
  }
  func.func @transform_9(%arg0: i32) -> (i32, i32) {
    %c0_i32 = arith.constant 0 : i32
    %c0_i32_0 = arith.constant 0 : i32
    %c0_i32_1 = arith.constant 0 : i32
    return %c0_i32, %c0_i32_0 : i32, i32
  }
  func.func @transform_10(%arg0: i32) -> (i32, i32) {
    %c0_i32 = arith.constant 0 : i32
    %c0_i32_0 = arith.constant 0 : i32
    %c0_i32_1 = arith.constant 0 : i32
    return %c0_i32, %c0_i32_0 : i32, i32
  }
}

</mosaic_0001>

<bundles_post_ra>
// kernel: tpu_custom_call.1
= control target key start
LH: loop header
LB: loop body
LE: loop exit
PB: predicated region body
PF: predicated region fallthrough
CT: control target
= control target key end

     0   :  { %s2776_s0 = inlined_call_operand.hbm [shape: bf16[8,8,32], index: 0, kind: input, shape index: {}]   ;;  %s2777_s1 = inlined_call_operand.hbm [shape: bf16[8,8,32], index: 1, kind: input, shape index: {}]   ;;  %s2778_s2 = inlined_call_operand.hbm [shape: bf16[32,128], index: 2, kind: input, shape index: {}]   ;;  %s2779_s3 = inlined_call_operand.hbm [shape: bf16[32,128], index: 3, kind: input, shape index: {}]   ;;  %s2780_s4 = inlined_call_operand.hbm [shape: bf16[32,128], index: 4, kind: input, shape index: {}]   ;;  %s2781_s5 = inlined_call_operand.vmem [shape: bf16[32,128], index: 5, kind: input, shape index: {}]   ;;  %s2782_s6 = inlined_call_operand.vmem [shape: f32[1,128], index: 6, kind: input, shape index: {}]   ;;  %s2783_s7 = inlined_call_operand.vmem [shape: f32[1,128], index: 7, kind: input, shape index: {}]   ;;  %s2784_s8 = inlined_call_operand.hbm [shape: bf16[64,128], index: 8, kind: input, shape index: {}]   ;;  %s2785_s9 = inlined_call_operand.vmem [shape: f32[1,128], index: 9, kind: input, shape index: {}]   ;;  %s2786_s10 = inlined_call_operand.hbm [shape: f32[8,128], index: 10, kind: output, shape index: {}]  }
   0x1   :  { %2794 = sst [smem:[#allocation26_spill]] %s2776_s0 }
   0x2   :  { %2795 = sst [smem:[#allocation27_spill]] %s2781_s5 }
   0x3   :  { %2796 = sst [smem:[#allocation28_spill]] %s2782_s6 }
   0x4   :  { %2797 = sst [smem:[#allocation29_spill]] %s2783_s7 }
   0x5   :  { %2798 = sst [smem:[#allocation30_spill]] %s2785_s9 }
   0x6   :  { %2799 = sst [smem:[#allocation31_spill]] %s2786_s10 }
   0x7   :  { %15 = vsyncpa [#allocation9], 0 }
   0x8   :  { %17 = vsyncpa [#allocation9 + $0x1], 0 }
   0x9   :  { %18 = vsyncpa [#allocation12], 0 }
   0xa   :  { %20 = vsyncpa [#allocation12 + $0x1], 0 }
   0xb   :  { %21 = vsyncpa [#allocation15], 0 }
   0xc   :  { %22 = vsyncpa [#allocation18], 0 }
   0xd   :  { %23 = vsyncpa [#allocation10], 0  ;;  %s2248_s13 = smov 0   ;;  %s2250_s14 = smov 0  }
   0xe   :  { %s2252_s15 = smov 0   ;;  %s2254_s16 = smov 0  }
   0xf   :  { %s2256_s17 = smov 0   ;;  %s2258_s18 = smov 0  }
  0x10   :  { %s2260_s19 = smov 0  }
  0x11 LB: > { %s2282_s20 = sadd.s32 4294967295, %s2173_s19   ;;  %p77_p0 = scmp.ne.s32.totalorder %s2153_s14, %s2149_s13  ;;  %s2173_s19 = sphi %s2260_s19, %s2831_s19   ;;  %s2169_s18 = sphi %s2258_s18, %s2830_s18   ;;  %s2165_s17 = sphi %s2256_s17, %s2829_s17   ;;  %s2161_s16 = sphi %s2254_s16, %s2828_s16   ;;  %s2157_s15 = sphi %s2252_s15, %s2827_s15   ;;  %s2153_s14 = sphi %s2250_s14, %s2826_s14   ;;  %s2149_s13 = sphi %s2248_s13, %s2825_s13  }
  0x12   : > { %p2788_p1 = scmp.eq.s32.totalorder %s2282_s20, 0  ;;  %p1518_p2 = scmp.ge.s32.totalorder %s2173_s19, 1 }
  0x13   : > { %p277_p3 = scmp.lt.s32.totalorder %s2173_s19, 3  ;;  %s2175_s23 = smov [#allocation13]  }
  0x14   : > { %p2291_p5 = por %p77_p0, %p2788_p1  ;;  %s289_s24 = sshll.u32 %s2175_s23, 4  ;;  %s2299_s24 = int_to_ptr.vmem [resolvable:$true] %s289_s24 }
  0x15   : > { %p2295_p6 = pnand %p1518_p2, %p277_p3  ;;  %s2176_s26 = smov [#allocation14]  }
  0x16   : > { %s2800_s21 = scalar_select %p2291_p5, 1, 0 }
  0x17   : > { %s2801_s22 = scalar_select %p2295_p6, 1, 0 }
  0x18   : > { %p1730_p7 = pneg %p2295_p6  ;;  %s302_s27 = sshll.u32 %s2176_s26, 4  ;;  %s2309_s27 = int_to_ptr.vmem [resolvable:$true] %s302_s27 }
  0x19   : > { %s2177_s28 = smov [#allocation16]   ;;  %s1897_s12 = scalar_lea.hbm %s2778_s2, 256 }
  0x1a   : > { %p2305_p8 = pnand %p1730_p7, %p2788_p1  ;;  %s2311_s29 = sshll.u32 %s2177_s28, 4  ;;  %s316_s29 = int_to_ptr.vmem [resolvable:$true] %s2311_s29 }
  0x1b   : > { %p1898_p9 = scmp.ne.s32.totalorder %s2778_s2, %s1897_s12  ;;  %p1904_p13 = scmp.lt.u32.totalorder %s1897_s12, %s2778_s2 }
  0x1c   : > { %p2321_p10 = pneg %p2305_p8 }
  0x1e   : > { %p1900_p11 = pnand %p2321_p10, %p1898_p9 }
  0x20   : > { %p1901_p12 = pneg %p1900_p11 }
  0x22   : > { %p1906_p0 = pnand %p1904_p13, %p1901_p12 }
  0x24   : > { %1909 = shalt.err (!%p1906_p0)
}
  0x25   : > { %s1910_s30 = scalar_lea.vmem %s2299_s24, 256  ;;  %p1918_p4 = scmp.lt.s32.totalorder %s2299_s24, %s2299_s24 }
  0x26   : > { %p1911_p2 = scmp.ne.s32.totalorder %s2299_s24, %s1910_s30  ;;  %p1919_p1 = scmp.lt.s32.totalorder %s1910_s30, %s1910_s30 }
  0x28   : > { %p1913_p3 = pnand %p1911_p2, %p2321_p10  ;;  %p1920_p9 = por %p1919_p1, %p1918_p4 }
  0x2a   : > { %p1914_p7 = pneg %p1913_p3 }
  0x2c   : > { %p1921_p11 = pnand %p1920_p9, %p1914_p7 }
  0x2e   : > { %1924 = shalt.err (!%p1921_p11)
}
  0x2f   : > { %s2178_s11 = smov 64   ;;  %s2179_s12 = smov 4  }
  0x30   : > { %1733 = dma.hbm_to_vmem [thread:$0]  (!%p2305_p8), %s2778_s2, 256, %s2299_s24, [#allocation12], %s2178_s11, %s2178_s11, %s2179_s12  }
  0x31   : > { %s1925_s30 = scalar_lea.hbm %s2779_s3, 256 }
  0x32   : > { %p1926_p1 = scmp.ne.s32.totalorder %s2779_s3, %s1925_s30  ;;  %p1932_p13 = scmp.lt.u32.totalorder %s1925_s30, %s2779_s3 }
  0x34   : > { %p1928_p4 = pnand %p1926_p1, %p2321_p10 }
  0x36   : > { %p1929_p12 = pneg %p1928_p4 }
  0x38   : > { %p1934_p0 = pnand %p1932_p13, %p1929_p12 }
  0x3a   : > { %1937 = shalt.err (!%p1934_p0)
}
  0x3b   : > { %s1938_s24 = scalar_lea.vmem %s2309_s27, 256  ;;  %p1946_p9 = scmp.lt.s32.totalorder %s2309_s27, %s2309_s27 }
  0x3c   : > { %p1939_p2 = scmp.ne.s32.totalorder %s2309_s27, %s1938_s24  ;;  %p1947_p11 = scmp.lt.s32.totalorder %s1938_s24, %s1938_s24 }
  0x3e   : > { %p1941_p3 = pnand %p1939_p2, %p2321_p10  ;;  %p1948_p1 = por %p1947_p11, %p1946_p9 }
  0x40   : > { %p1942_p7 = pneg %p1941_p3 }
  0x42   : > { %p1949_p4 = pnand %p1948_p1, %p1942_p7 }
  0x44   : > { %1952 = shalt.err (!%p1949_p4)
}
  0x45   : > { %1736 = dma.hbm_to_vmem [thread:$0]  (!%p2305_p8), %s2779_s3, 256, %s2309_s27, [#allocation15], %s2178_s11, %s2178_s11, %s2179_s12  }
  0x46   : > { %s1953_s13 = scalar_lea.hbm %s2780_s4, 256 }
  0x47   : > { %p1954_p12 = scmp.ne.s32.totalorder %s2780_s4, %s1953_s13  ;;  %p1960_p2 = scmp.lt.u32.totalorder %s1953_s13, %s2780_s4 }
  0x49   : > { %p1956_p13 = pnand %p1954_p12, %p2321_p10 }
  0x4b   : > { %p1957_p0 = pneg %p1956_p13 }
  0x4d   : > { %p1962_p3 = pnand %p1960_p2, %p1957_p0 }
  0x4f   : > { %1965 = shalt.err (!%p1962_p3)
}
  0x50   : > { %s1966_s24 = scalar_lea.vmem %s316_s29, 256  ;;  %p1974_p1 = scmp.lt.s32.totalorder %s316_s29, %s316_s29 }
  0x51   : > { %p1967_p7 = scmp.ne.s32.totalorder %s316_s29, %s1966_s24  ;;  %p1975_p4 = scmp.lt.s32.totalorder %s1966_s24, %s1966_s24 }
  0x53   : > { %p1969_p9 = pnand %p1967_p7, %p2321_p10  ;;  %p1976_p5 = por %p1975_p4, %p1974_p1 }
  0x55   : > { %p1970_p11 = pneg %p1969_p9 }
  0x57   : > { %p1977_p6 = pnand %p1976_p5, %p1970_p11 }
  0x59   : > { %1980 = shalt.err (!%p1977_p6)
}
  0x5a   : > { %1739 = dma.hbm_to_vmem [thread:$0]  (!%p2305_p8), %s2780_s4, 256, %s316_s29, [#allocation15], %s2178_s11, %s2178_s11, %s2179_s12  }
  0x5b   : > { %s2180_s6 = smov [#allocation17]   ;;  %s1981_s23 = scalar_lea.hbm %s2784_s8, 512 }
  0x5c   : > { %s337_s7 = sshll.u32 %s2180_s6, 4  ;;  %p1982_p5 = scmp.ne.s32.totalorder %s2784_s8, %s1981_s23  ;;  %s338_s7 = int_to_ptr.vmem [resolvable:$true] %s337_s7 }
  0x5d   : > { %p1988_p13 = scmp.lt.u32.totalorder %s1981_s23, %s2784_s8 }
  0x5e   : > { %p1984_p6 = pnand %p1982_p5, %p2321_p10 }
  0x60   : > { %p1985_p12 = pneg %p1984_p6 }
  0x62   : > { %p1990_p0 = pnand %p1988_p13, %p1985_p12 }
  0x64   : > { %1993 = shalt.err (!%p1990_p0)
}
  0x65   : > { %s1994_s29 = scalar_lea.vmem %s338_s7, 512  ;;  %p2002_p9 = scmp.lt.s32.totalorder %s338_s7, %s338_s7 }
  0x66   : > { %p1995_p2 = scmp.ne.s32.totalorder %s338_s7, %s1994_s29  ;;  %p2003_p11 = scmp.lt.s32.totalorder %s1994_s29, %s1994_s29 }
  0x68   : > { %p1997_p3 = pnand %p1995_p2, %p2321_p10  ;;  %p2004_p1 = por %p2003_p11, %p2002_p9 }
  0x6a   : > { %p1998_p7 = pneg %p1997_p3 }
  0x6c   : > { %p2005_p4 = pnand %p2004_p1, %p1998_p7 }
  0x6e   : > { %2008 = shalt.err (!%p2005_p4)
}
  0x6f   : > { %1742 = dma.hbm_to_vmem [thread:$0]  (!%p2305_p8), %s2784_s8, 512, %s338_s7, [#allocation18], %s2178_s11, %s2178_s11, %s2179_s12  }
  0x70   : > { %s36_s10 = sadd.s32 1, %s2169_s18  ;;  %p43_p10 = scmp.ne.s32.totalorder %s2169_s18, %s2165_s17 }
  0x71   : > { %p2793_p5 = scmp.eq.s32.totalorder %s2173_s19, 0  ;;  %p49_p6 = scmp.ne.s32.totalorder %s2165_s17, %s2161_s16 }
  0x72   : > { %p2792_p12 = scmp.lt.s32.totalorder %s2173_s19, 2  ;;  %s354_s25 = sand.u32 1, %s2169_s18  }
  0x73   : > { %p45_p13 = por %p2793_p5, %p43_p10  ;;  %p2804_p0 = scmp.eq.s32.totalorder %s2282_s20, 0 }
  0x74   : > { %s1524_s9 = sshll.u32 %s354_s25, 4  ;;  %s1575_s13 = sshll.u32 %s2173_s19, 8 }
  0x75   : > { %p2426_p2 = por %p2804_p0, %p49_p6  ;;  %s2806_s0 = sld [smem:[#allocation26_spill]] }
  0x76   : > { %s358_s16 = scalar_lea.vmem [#allocation8], %s1524_s9  ;;  %p2440_p8 = pnand %p2792_p12, %p45_p13 }
  0x77   : > { %s365_s28 = sshll.u32 %s358_s16, 4  ;;  %s2445_s24 = sadd.s32 1, %s2173_s19   ;;  %s2436_s28 = int_to_ptr.vmem [resolvable:$true] %s365_s28 }
  0x78   : > { %s2447_s29 = scalar_lea.sflag [#allocation9], %s354_s25  ;;  %p2011_p7 = pneg %p2440_p8 }
  0x7b   : > { %s2434_s7 = scalar_lea.hbm %s2806_s0, %s1575_s13  ;;  %s2014_s13 = scalar_lea.hbm %s2806_s0, 512 }
  0x7c   : > { %s2009_s27 = scalar_lea.hbm %s2434_s7, 256  ;;  %p2015_p1 = scmp.lt.u32.totalorder %s2434_s7, %s2806_s0 }
  0x7d   : > { %p2010_p3 = scmp.ne.s32.totalorder %s2434_s7, %s2009_s27  ;;  %p2016_p4 = scmp.lt.u32.totalorder %s2014_s13, %s2009_s27 }
  0x7e   : > { %p2018_p6 = scmp.lt.u32.totalorder %s2009_s27, %s2434_s7 }
  0x7f   : > { %p2012_p9 = pnand %p2011_p7, %p2010_p3  ;;  %p2017_p10 = por %p2016_p4, %p2015_p1 }
  0x81   : > { %p2013_p11 = pneg %p2012_p9  ;;  %p2019_p13 = por %p2018_p6, %p2017_p10 }
  0x83   : > { %p2020_p0 = pnand %p2019_p13, %p2013_p11 }
  0x85   : > { %2023 = shalt.err (!%p2020_p0)
}
  0x86   : > { %s2024_s25 = scalar_lea.vmem %s2436_s28, 256  ;;  %s2181_s16 = smov [#allocation8]  }
  0x87   : > { %p2025_p3 = scmp.ne.s32.totalorder %s2436_s28, %s2024_s25  ;;  %s2029_s5 = sshll.u32 %s2181_s16, 4  ;;  %s2030_s5 = int_to_ptr.vmem [resolvable:$false] %s2029_s5 }
  0x88   : > { %s2031_s9 = scalar_lea.vmem %s2030_s5, 512  ;;  %p2032_p5 = scmp.lt.s32.totalorder %s2436_s28, %s2030_s5 }
  0x89   : > { %p2027_p9 = pnand %p2025_p3, %p2011_p7  ;;  %p2033_p1 = scmp.lt.s32.totalorder %s2031_s9, %s2024_s25 }
  0x8b   : > { %p2028_p12 = pneg %p2027_p9  ;;  %p2034_p4 = por %p2033_p1, %p2032_p5 }
  0x8d   : > { %p2035_p10 = pnand %p2034_p4, %p2028_p12 }
  0x8f   : > { %2038 = shalt.err (!%p2035_p10)
}
  0x90   : > { %1746 = dma.hbm_to_vmem [thread:$0]  (!%p2440_p8), %s2434_s7, 256, %s2436_s28, %s2447_s29, %s2178_s11, %s2178_s11, %s2179_s12  }
  0x91   : > { %s33_s30 = ssub.s32 %s2173_s19, %s2445_s24  ;;  %s59_s27 = ssub.s32 1, %s2173_s19 }
  0x92   : > { %p34_p5 = scmp.eq.s32.totalorder %s33_s30, 0  ;;  %s60_s13 = ssub.s32 1, %s2445_s24 }
  0x93   : > { %s61_s23 = ssub.s32 %s59_s27, %s60_s13  ;;  %s64_s26 = sadd.s32 1, %s2157_s15 }
  0x94   : > { %s2486_s25 = scalar_select %p34_p5, %s2169_s18, %s36_s10  }
  0x95   : > { %p62_p12 = scmp.eq.s32.totalorder %s61_s23, 0  ;;  %p71_p7 = scmp.ne.s32.totalorder %s2157_s15, %s2153_s14 }
  0x96   : > { %s375_s16 = sand.u32 1, %s2173_s19   ;;  %s377_s5 = sand.u32 1, %s2157_s15  }
  0x97   : > { %s2493_s9 = scalar_select %p62_p12, %s2157_s15, %s64_s26  }
  0x98   : > { %p2808_p11 = scmp.eq.s32.totalorder %s2173_s19, 0  ;;  %s1527_s0 = sshll.u32 %s377_s5, 4 }
  0x99   : > { %s1576_s7 = sshll.u32 %s59_s27, 8  ;;  %s379_s10 = scalar_lea.vmem [#allocation11], %s1527_s0 }
  0x9a   : > { %p73_p6 = por %p71_p7, %p2808_p11  ;;  %s2500_s30 = scalar_lea.hbm %s2777_s1, %s1576_s7 }
  0x9b   : > { %s387_s13 = sshll.u32 %s379_s10, 4  ;;  %p2809_p8 = scmp.lt.s32.totalorder %s2173_s19, 2  ;;  %s2508_s13 = int_to_ptr.vmem [resolvable:$true] %s387_s13 }
  0x9c   : > { %s2510_s27 = scalar_lea.sflag [#allocation12], %s375_s16  ;;  %s2039_s26 = scalar_lea.hbm %s2500_s30, 256 }
  0x9d   : > { %p2504_p13 = pnand %p2809_p8, %p73_p6  ;;  %p2040_p0 = scmp.ne.s32.totalorder %s2500_s30, %s2039_s26 }
  0x9e   : > { %s2044_s5 = scalar_lea.hbm %s2777_s1, 512  ;;  %p2045_p4 = scmp.lt.u32.totalorder %s2500_s30, %s2777_s1 }
  0x9f   : > { %p2041_p3 = pneg %p2504_p13  ;;  %p2046_p10 = scmp.lt.u32.totalorder %s2044_s5, %s2039_s26 }
  0xa0   : > { %p2048_p12 = scmp.lt.u32.totalorder %s2039_s26, %s2500_s30 }
  0xa1   : > { %p2042_p9 = pnand %p2041_p3, %p2040_p0  ;;  %p2047_p5 = por %p2046_p10, %p2045_p4 }
  0xa3   : > { %p2043_p1 = pneg %p2042_p9  ;;  %p2049_p7 = por %p2048_p12, %p2047_p5 }
  0xa5   : > { %p2050_p11 = pnand %p2049_p7, %p2043_p1 }
  0xa7   : > { %2053 = shalt.err (!%p2050_p11)
}
  0xa8   : > { %s2054_s16 = scalar_lea.vmem %s2508_s13, 256  ;;  %s2182_s29 = smov [#allocation11]  }
  0xa9   : > { %p2055_p6 = scmp.ne.s32.totalorder %s2508_s13, %s2054_s16  ;;  %s2059_s10 = sshll.u32 %s2182_s29, 4  ;;  %s2060_s10 = int_to_ptr.vmem [resolvable:$false] %s2059_s10 }
  0xaa   : > { %s2061_s0 = scalar_lea.vmem %s2060_s10, 512  ;;  %p2062_p9 = scmp.lt.s32.totalorder %s2508_s13, %s2060_s10 }
  0xab   : > { %p2057_p8 = pnand %p2055_p6, %p2041_p3  ;;  %p2063_p4 = scmp.lt.s32.totalorder %s2061_s0, %s2054_s16 }
  0xad   : > { %p2058_p0 = pneg %p2057_p8  ;;  %p2064_p10 = por %p2063_p4, %p2062_p9 }
  0xaf   : > { %p2065_p5 = pnand %p2064_p10, %p2058_p0 }
  0xb1   : > { %2068 = shalt.err (!%p2065_p5)
}
  0xb2   : > { %1749 = dma.hbm_to_vmem [thread:$0]  (!%p2504_p13), %s2500_s30, 256, %s2508_s13, %s2510_s27, %s2178_s11, %s2178_s11, %s2179_s12  }
  0xb3   : > { %p2811_p3 = scmp.ne.s32.totalorder %s2801_s22, 0 }
  0xb4   : > { %s401_s26 = sand.u32 (!%p2811_p3), 1, %s2165_s17  }
  0xb5   : > { %399 = sbr.rel (%p2811_p3) target bundleno = 3302 (0xce6), region = 60  ;;  %s2544_s19 = sshll.u32 (!%p2811_p3), %s401_s26, 4 }
  0xb6   : > { %s402_s5 = scalar_lea.sflag (!%p2811_p3), [#allocation9], %s401_s26  ;;  %s405_s7 = scalar_lea.vmem (!%p2811_p3), [#allocation8], %s2544_s19 }
  0xbc   : > { %2124 = dma.done.wait (%p2426_p2), %s402_s5, 256  }
  0xbd   : > { %2126 = vsyncadd (%p2426_p2), %s402_s5, 4294967040  ;;  %s410_s11 = sand.u32 1, %s2282_s20   ;;  %s412_s12 = sand.u32 1, %s2153_s14  }
  0xbe   : > { %s2553_s22 = sshll.u32 %s412_s12, 4  ;;  %s411_s30 = scalar_lea.sflag [#allocation12], %s410_s11 }
  0xbf   : > { %s414_s13 = scalar_lea.vmem [#allocation11], %s2553_s22  ;;  %p2812_p13 = scmp.ne.s32.totalorder %s2800_s21, 0 }
  0xc1   : > { %2128 = dma.done.wait (%p2812_p13), %s411_s30, 256  }
  0xc2   : > { %2130 = vsyncadd (%p2812_p13), %s411_s30, 4294967040  ;;  %p2813_p1 = scmp.eq.s32.totalorder %s2282_s20, 0 }
  0xc4   : > { %2132 = dma.done.wait (%p2813_p1), [#allocation12], 256   ;;  %p2814_p2 = pmov %p2813_p1 }
  0xc5   : > { %p2815_p12 = pmov %p2813_p1 }
  0xc6   : > { %2134 = vsyncadd (%p2814_p2), [#allocation12], 4294967040 }
  0xc7   : > { %2136 = dma.done.wait (%p2815_p12), [#allocation15], 512   ;;  %p2816_p7 = pmov %p2813_p1 }
  0xc8   : > { %p2817_p11 = pmov %p2813_p1 }
  0xc9   : > { %2138 = vsyncadd (%p2816_p7), [#allocation15], 4294966784 }
  0xca   : > { %2140 = dma.done.wait (%p2817_p11), [#allocation18], 512   ;;  %p2818_p6 = pmov %p2813_p1 }
  0xcb   : > { %p2819_p8 = scmp.ne.s32.totalorder %s2282_s20, 0 }
  0xcc   : > { %2142 = vsyncadd (%p2818_p6), [#allocation18], 4294966784  ;;  %vm475_vm0 = vcmask (!%p2819_p8), 261120   ;;  %v2183_v0 = vmov (!%p2819_p8), 0.0  }
  0xcd   : > { %474 = sbr.rel (%p2819_p8) target bundleno = 212 (0xd4), region = 88  ;;  %476 = vst.msk [vmem:[#allocation4] sm:$0xff] (!%p2819_p8), %vm475_vm0, %v2183_v0  ;;  %477 = vst.msk [vmem:[#allocation5] sm:$0xff] (!%p2819_p8), %vm475_vm0, %v2183_v0 }
  0xce   : > { %478 = vst.msk [vmem:[#allocation6] sm:$0xff] (!%p2819_p8), %vm475_vm0, %v2183_v0  ;;  %479 = vst.msk [vmem:[#allocation7] sm:$0xff] (!%p2819_p8), %vm475_vm0, %v2183_v0 }
  0xd4 PF: > { %v1833_v1 = vld [vmem:[#allocation13] sm:$0xff]   ;;  %v1834_v2 = vld [vmem:[#allocation14] sm:$0xff]   ;;  %v1835_v3 = vld [vmem:[#allocation13 + $0x8] sm:$0xff]   ;;  %vm517_vm1 = vcmask 261120   ;;  %v2184_v9 = vmov 0.0   ;;  %s2820_s23 = sld [smem:[#allocation27_spill]] }
  0xd5   : > { %1614 = vmatprep.subr.bf16.mxu0 %v1833_v1  ;;  %1622 = vmatprep.subr.bf16.mxu1 %v1834_v2  ;;  %v1836_v4 = vld [vmem:[#allocation14 + $0x8] sm:$0xff]   ;;  %v1837_v5 = vld [vmem:[%s405_s7] sm:$0xff]   ;;  %v2594_v12 = vld [vmem:[#allocation16 + $0x8] sm:$0xff]   ;;  %vm2185_vm2 = vmmov 0   ;;  %s2186_s16 = smov 32   ;;  %s2821_s0 = sld [smem:[#allocation28_spill]] }
  0xd6   : > { %1615 = vmatpush3.bf16.msra.mxu0 %v1833_v1  ;;  %1623 = vmatpush3.bf16.msra.mxu1 %v1834_v2  ;;  %v1838_v6 = vld [vmem:[%s414_s13] sm:$0xff]   ;;  %v1839_v7 = vld [vmem:[%s405_s7 + $0x8] sm:$0xff]   ;;  %s2822_s5 = sld [smem:[#allocation29_spill]]  ;;  %s2187_s7 = smov 64  }
  0xd7   : > { %1616 = vmatprep.subr.bf16.mxu0 %v1835_v3  ;;  %1624 = vmatprep.subr.bf16.mxu1 %v1836_v4  ;;  %v1840_v8 = vld [vmem:[%s414_s13 + $0x8] sm:$0xff]   ;;  %v2585_v10 = vld [vmem:[#allocation16] sm:$0xff]   ;;  %v683_v15 = vld [vmem:[#allocation6] sm:$0xff]  ;;  %s2188_s11 = smov 96   ;;  %p1564_p0 = scmp.ne.s32.totalorder %s2282_s20, 1 }
  0xd8   : > { %1618 = vmatprep.mubr.msk.bf16.mxu0 %vm517_vm1, %v1837_v5  ;;  %1626 = vmatprep.mubr.msk.bf16.mxu1 %vm517_vm1, %v1838_v6  ;;  %v681_v14 = vld [vmem:[#allocation4] sm:$0xff]  ;;  %v682_v16 = vld [vmem:[#allocation5] sm:$0xff]  ;;  %v771_v18 = vpack.c.bf16 %v683_v15, %v683_v15  ;;  %v684_v19 = vld [vmem:[#allocation7] sm:$0xff]  ;;  %s2189_s12 = smov (!%p1564_p0), 96   ;;  %vm2191_vm3 = vmmov (!%p1564_p0), 0   ;;  %vm1354_vm4 = vcmask (!%p1564_p0), 523264  }
  0xd9   : > { %v686_v17 = vpack.c.bf16 %v681_v14, %v681_v14  ;;  %749 = vrot.lane.b32.xlu1 %v682_v16, %s2186_s16  ;;  %s2823_s13 = sld [smem:[#allocation30_spill]] (!%p1564_p0) }
  0xda   : > { %1617 = vmatpush3.bf16.msra.mxu0 %v1835_v3  ;;  %1625 = vmatpush3.bf16.msra.mxu1 %v1836_v4  ;;  %v2591_v11 = vld [vmem:[%s2820_s23] sm:$0xff]   ;;  %v2601_v13 = vld [vmem:[%s2820_s23 + $0x8] sm:$0xff]  }
  0xdb   : > { %1630 = vmatprep.subr.bf16.mxu0 %v2184_v9  ;;  %1638 = vmatprep.subr.bf16.mxu1 %v2184_v9  ;;  %v1538_v20 = vld [vmem:[%s2821_s0] ss:$0 sm:$0xff] }
  0xdc   : > { %v1545_v21 = vld [vmem:[%s2822_s5] ss:$0 sm:$0xff] }
  0xdd   : > { %1619 = vmatmul.mubr.msk.bf16.vlgmr.msra.gmra.mrb[0].mxu0 %vm517_vm1, %v1839_v7  ;;  %1627 = vmatmul.mubr.msk.bf16.vlgmr.msra.gmra.mrb[0].mxu1 %vm517_vm1, %v1840_v8 }
  0xde   : > { %1631 = vmatpush3.bf16.msra.mxu0 %v2585_v10  ;;  %1639 = vmatpush3.bf16.msra.mxu1 %v2591_v11 }
  0xdf   : > { %1632 = vmatprep.subr.bf16.mxu0 %v2184_v9  ;;  %1640 = vmatprep.subr.bf16.mxu1 %v2184_v9 }
  0xe0   : > { %1634 = vmatprep.mubr.msk.bf16.mxu0 %vm2185_vm2, %v2184_v9  ;;  %1642 = vmatprep.mubr.msk.bf16.mxu1 %vm2185_vm2, %v2184_v9 }
  0xe1   : > { %834 = vrot.lane.b32.xlu1 %v684_v19, %s2186_s16 }
  0xe2   : > { %1633 = vmatpush3.bf16.msra.mxu0 %v2594_v12  ;;  %1641 = vmatpush3.bf16.msra.mxu1 %v2601_v13 }
  0xe3   : > { %1646 = vmatprep.subr.bf16.mxu0 %v2184_v9  ;;  %1654 = vmatprep.subr.bf16.mxu1 %v2184_v9 }
  0xe5   : > { %1635 = vmatmul.mubr.msk.bf16.vlgmr.msra.gmra.mrb[4].mxu0 %vm517_vm1, %v686_v17  ;;  %1643 = vmatmul.mubr.msk.bf16.vlgmr.msra.gmra.mrb[4].mxu1 %vm517_vm1, %v771_v18 }
  0xe6   : > { %1647 = vmatpush3.bf16.msra.mxu0 %v2585_v10  ;;  %1655 = vmatpush3.bf16.msra.mxu1 %v2591_v11 }
  0xe7   : > { %1648 = vmatprep.subr.bf16.mxu0 %v2184_v9  ;;  %1650 = vmatprep.mubr.msk.bf16.mxu0 %vm2185_vm2, %v2184_v9 }
  0xe8   : > { %1656 = vmatprep.subr.bf16.mxu1 %v2184_v9  ;;  %1658 = vmatprep.mubr.msk.bf16.mxu1 %vm2185_vm2, %v2184_v9 }
  0xea   : > { %1649 = vmatpush3.bf16.msra.mxu0 %v2594_v12  ;;  %1657 = vmatpush3.bf16.msra.mxu1 %v2601_v13 }
  0xeb   : > { %1662 = vmatprep.subr.bf16.mxu0 %v2184_v9  ;;  %1670 = vmatprep.subr.bf16.mxu1 %v2184_v9 }
 0x14b   : > { %v750_v62 = vpop.permute.xlu1 %749 }
 0x153   : > { %v835_v0 = vpop.permute.xlu1 %834 }
 0x1b0   : > { %v1620_v22 = vpop.f32.mrb[0].mxu0  ;;  %v1628_v25 = vpop.f32.mrb[0].mxu1 }
 0x1b1   : > { %v2636_v23 = vadd.f32 %v1620_v22, %v1538_v20  ;;  %v558_v24 = vpop.f32.mrb[1].mxu0  ;;  %v2638_v27 = vadd.f32 %v1628_v25, %v1545_v21  ;;  %v654_v28 = vpop.f32.mrb[1].mxu1 }
 0x1b2   : > { %v1621_v26 = vpop.f32.mrb[2].mxu0  ;;  %v2642_v31 = vadd.f32 %v1545_v21, %v654_v28  ;;  %v1629_v32 = vpop.f32.mrb[2].mxu1  ;;  %v559_v36 = vadd.f32 %v1538_v20, %v558_v24 }
 0x1b3   : > { %v2640_v29 = vadd.f32 %v1621_v26, %v1538_v20  ;;  %v561_v30 = vpop.f32.mrb[3].mxu0  ;;  %v657_v34 = vpop.f32.mrb[3].mxu1  ;;  %v666_v37 = vadd.f32 %v1629_v32, %v1545_v21 }
 0x1b4   : > { %v2644_v33 = vadd.f32 %v1538_v20, %v561_v30  ;;  %v2646_v35 = vadd.f32 %v1545_v21, %v657_v34 }
 0x1b8   : > { %v736_v38 = vpop.f32.mrb[4].mxu0  ;;  %v821_v40 = vpop.f32.mrb[4].mxu1 }
 0x1b9   : > { %v742_v39 = vadd.f32 %v736_v38, %v559_v36  ;;  %v1636_v41 = vpop.f32.mrb[5].mxu0  ;;  %v827_v42 = vadd.f32 %v821_v40, %v666_v37  ;;  %v1644_v44 = vpop.f32.mrb[5].mxu1 }
 0x1ba   : > { %v739_v43 = vpop.f32.mrb[6].mxu0  ;;  %v824_v46 = vpop.f32.mrb[6].mxu1 }
 0x1bb   : > { %1845 = vtanh.f32 %v742_v39  ;;  %v1637_v45 = vpop.f32.mrb[7].mxu0  ;;  %v1645_v47 = vpop.f32.mrb[7].mxu1  ;;  %v743_v50 = vmul.f32 0.5, %v742_v39  ;;  %v828_v51 = vmul.f32 0.5, %v827_v42 }
 0x1bc   : > { %1847 = vtanh.f32 %v827_v42 }
 0x1bd   : > { %1849 = vtanh.f32 %v743_v50 }
 0x1be   : > { %1851 = vtanh.f32 %v828_v51 }
 0x1c5   : > { %v1846_v48 = vpop.eup %1845 }
 0x1c6   : > { %754 = vrot.lane.b32.xlu0 %v1846_v48, %s2186_s16  ;;  %v1848_v49 = vpop.eup %1847 }
 0x1c7   : > { %v1850_v52 = vpop.eup %1849 }
 0x1c8   : > { %v745_v53 = vmul.f32 0.5, %v1850_v52  ;;  %v1852_v54 = vpop.eup %1851 }
 0x1c9   : > { %v830_v56 = vmul.f32 0.5, %v1852_v54 }
 0x1ca   : > { %839 = vrot.lane.b32.xlu0 %v1848_v49, %s2186_s16  ;;  %v746_v55 = vadd.f32 0.5, %v745_v53 }
 0x1cb   : > { %v831_v59 = vadd.f32 0.5, %v830_v56 }
 0x1cc   : > { %v752_v63 = vmul.f32 %v750_v62, %v746_v55 }
 0x1cd   : > { %v837_v3 = vmul.f32 %v835_v0, %v831_v59 }
 0x238   : > { %v755_v57 = vpop.permute.xlu0 %754 }
 0x239   : > { %v757_v58 = vmul.f32 %v755_v57, %v746_v55 }
 0x23b   : > { %759 = vrot.lane.b32.xlu0 %v757_v58, %s2186_s16 }
 0x23c   : > { %v840_v60 = vpop.permute.xlu0 %839 }
 0x23d   : > { %v842_v61 = vmul.f32 %v840_v60, %v831_v59 }
 0x23f   : > { %844 = vrot.lane.b32.xlu1 %v842_v61, %s2186_s16 }
 0x2ad   : > { %v760_v1 = vpop.permute.xlu0 %759 }
 0x2ae   : > { %v2652_v2 = vadd.f32 %v760_v1, %v752_v63 }
 0x2b0   : > { %1853 = vtanh.f32 %v2652_v2 }
 0x2b1   : > { %v845_v4 = vpop.permute.xlu1 %844 }
 0x2b2   : > { %v2655_v5 = vadd.f32 %v845_v4, %v837_v3 }
 0x2b4   : > { %1855 = vtanh.f32 %v2655_v5 }
 0x2ba   : > { %v1854_v6 = vpop.eup %1853 }
 0x2bb   : > { %765 = vrot.lane.b32.xlu0 %v1854_v6, %s2186_s16 }
 0x2be   : > { %v1856_v7 = vpop.eup %1855 }
 0x2bf   : > { %850 = vrot.lane.b32.xlu1 %v1856_v7, %s2186_s16 }
 0x32d   : > { %v766_v8 = vpop.permute.xlu0 %765 }
 0x32e   : > { %v768_v14 = vmul.f32 %v766_v8, %v746_v55 }
 0x330   : > { %v856_v15 = vpack.c.bf16 %v768_v14, %v768_v14 }
 0x331   : > { %v851_v16 = vpop.permute.xlu1 %850 }
 0x332   : > { %v853_v17 = vmul.f32 %v851_v16, %v831_v59  ;;  %858 = vrot.lane.b32.xlu0 %v856_v15, %s2187_s7 }
 0x334   : > { %v928_v18 = vpack.c.bf16 %v853_v17, %v853_v17 }
 0x336   : > { %930 = vrot.lane.b32.xlu1 %v928_v18, %s2187_s7 }
 0x3a4   : > { %v859_v19 = vpop.permute.xlu0 %858 }
 0x3a5   : > { %1651 = vmatmul.mubr.msk.bf16.vlgmr.msra.gmra.mrb[8].mxu0 %vm517_vm1, %v859_v19 }
 0x3a6   : > { %1663 = vmatpush3.bf16.msra.mxu0 %v2585_v10  ;;  %1666 = vmatprep.mubr.msk.bf16.mxu0 %vm2185_vm2, %v2184_v9 }
 0x3a7   : > { %1664 = vmatprep.subr.bf16.mxu0 %v2184_v9 }
 0x3a8   : > { %v931_v20 = vpop.permute.xlu1 %930 }
 0x3a9   : > { %1659 = vmatmul.mubr.msk.bf16.vlgmr.msra.gmra.mrb[8].mxu1 %vm517_vm1, %v931_v20 }
 0x3aa   : > { %1665 = vmatpush3.bf16.msra.mxu0 %v2594_v12  ;;  %1671 = vmatpush3.bf16.msra.mxu1 %v2591_v11 }
 0x3ab   : > { %1672 = vmatprep.subr.bf16.mxu1 %v2184_v9  ;;  %1674 = vmatprep.mubr.msk.bf16.mxu1 %vm2185_vm2, %v2184_v9 }
 0x3ac   : > { %1678 = vmatprep.subr.bf16.mxu0 %v2184_v9 }
 0x3ae   : > { %1673 = vmatpush3.bf16.msra.mxu1 %v2601_v13 }
 0x3af   : > { %1686 = vmatprep.subr.bf16.mxu1 %v2184_v9 }
 0x478   : > { %v897_v21 = vpop.f32.mrb[8].mxu0 }
 0x479   : > { %v903_v22 = vadd.f32 %v897_v21, %v2644_v33  ;;  %v1652_v24 = vpop.f32.mrb[9].mxu0 }
 0x47a   : > { %v900_v25 = vpop.f32.mrb[10].mxu0 }
 0x47b   : > { %1857 = vtanh.f32 %v903_v22  ;;  %v1653_v26 = vpop.f32.mrb[11].mxu0  ;;  %v904_v39 = vmul.f32 0.5, %v903_v22 }
 0x47c   : > { %v969_v28 = vpop.f32.mrb[8].mxu1 }
 0x47d   : > { %v975_v30 = vadd.f32 %v969_v28, %v2638_v27  ;;  %v1660_v32 = vpop.f32.mrb[9].mxu1 }
 0x47e   : > { %v972_v34 = vpop.f32.mrb[10].mxu1 }
 0x47f   : > { %1859 = vtanh.f32 %v975_v30  ;;  %v1661_v36 = vpop.f32.mrb[11].mxu1  ;;  %v976_v33 = vmul.f32 0.5, %v975_v30 }
 0x480   : > { %1861 = vtanh.f32 %v904_v39 }
 0x481   : > { %1863 = vtanh.f32 %v976_v33 }
 0x485   : > { %v1858_v37 = vpop.eup %1857 }
 0x486   : > { %911 = vrot.lane.b32.xlu0 %v1858_v37, %s2186_s16 }
 0x489   : > { %v1860_v38 = vpop.eup %1859 }
 0x48a   : > { %983 = vrot.lane.b32.xlu1 %v1860_v38, %s2186_s16  ;;  %v1862_v40 = vpop.eup %1861 }
 0x48b   : > { %v906_v41 = vmul.f32 0.5, %v1862_v40  ;;  %v1864_v42 = vpop.eup %1863 }
 0x48c   : > { %v978_v44 = vmul.f32 0.5, %v1864_v42 }
 0x48d   : > { %v907_v43 = vadd.f32 0.5, %v906_v41 }
 0x48e   : > { %v979_v46 = vadd.f32 0.5, %v978_v44 }
 0x48f   : > { %v909_v49 = vmul.f32 %v907_v43, %v2652_v2 }
 0x490   : > { %v981_v52 = vmul.f32 %v979_v46, %v2655_v5 }
 0x4f8   : > { %v912_v27 = vpop.permute.xlu0 %911 }
 0x4f9   : > { %v914_v45 = vmul.f32 %v912_v27, %v907_v43 }
 0x4fb   : > { %916 = vrot.lane.b32.xlu0 %v914_v45, %s2186_s16 }
 0x4fc   : > { %v984_v47 = vpop.permute.xlu1 %983 }
 0x4fd   : > { %v986_v48 = vmul.f32 %v984_v47, %v979_v46 }
 0x4ff   : > { %988 = vrot.lane.b32.xlu1 %v986_v48, %s2186_s16 }
 0x56d   : > { %v917_v50 = vpop.permute.xlu0 %916 }
 0x56e   : > { %v919_v51 = vadd.f32 %v917_v50, %v909_v49 }
 0x570   : > { %1865 = vtanh.f32 %v919_v51 }
 0x571   : > { %v989_v53 = vpop.permute.xlu1 %988 }
 0x572   : > { %v991_v54 = vadd.f32 %v989_v53, %v981_v52 }
 0x574   : > { %1867 = vtanh.f32 %v991_v54 }
 0x57a   : > { %v1866_v55 = vpop.eup %1865 }
 0x57b   : > { %922 = vrot.lane.b32.xlu0 %v1866_v55, %s2186_s16 }
 0x57e   : > { %v1868_v56 = vpop.eup %1867 }
 0x57f   : > { %994 = vrot.lane.b32.xlu1 %v1868_v56, %s2186_s16 }
 0x5ed   : > { %v923_v57 = vpop.permute.xlu0 %922 }
 0x5ee   : > { %v925_v58 = vmul.f32 %v923_v57, %v907_v43 }
 0x5f0   : > { %v1000_v59 = vpack.c.bf16 %v925_v58, %v925_v58 }
 0x5f1   : > { %v995_v60 = vpop.permute.xlu1 %994 }
 0x5f2   : > { %v997_v61 = vmul.f32 %v995_v60, %v979_v46  ;;  %1002 = vrot.lane.b32.xlu0 %v1000_v59, %s2187_s7 }
 0x5f4   : > { %v1072_v62 = vpack.c.bf16 %v997_v61, %v997_v61 }
 0x5f6   : > { %1074 = vrot.lane.b32.xlu1 %v1072_v62, %s2187_s7 }
 0x664   : > { %v1003_v63 = vpop.permute.xlu0 %1002 }
 0x665   : > { %1667 = vmatmul.mubr.msk.bf16.vlgmr.msra.gmra.mrb[12].mxu0 %vm517_vm1, %v1003_v63 }
 0x666   : > { %1679 = vmatpush3.bf16.msra.mxu0 %v2585_v10  ;;  %1682 = vmatprep.mubr.msk.bf16.mxu0 %vm2185_vm2, %v2184_v9 }
 0x667   : > { %1680 = vmatprep.subr.bf16.mxu0 %v2184_v9 }
 0x668   : > { %v1075_v0 = vpop.permute.xlu1 %1074 }
 0x669   : > { %1675 = vmatmul.mubr.msk.bf16.vlgmr.msra.gmra.mrb[12].mxu1 %vm517_vm1, %v1075_v0 }
 0x66a   : > { %1681 = vmatpush3.bf16.msra.mxu0 %v2594_v12  ;;  %1687 = vmatpush3.bf16.msra.mxu1 %v2591_v11 }
 0x66b   : > { %1688 = vmatprep.subr.bf16.mxu1 %v2184_v9  ;;  %1690 = vmatprep.mubr.msk.bf16.mxu1 %vm2185_vm2, %v2184_v9 }
 0x66e   : > { %1689 = vmatpush3.bf16.msra.mxu1 %v2601_v13 }
 0x738   : > { %v1041_v10 = vpop.f32.mrb[12].mxu0 }
 0x739   : > { %v1047_v1 = vadd.f32 %v1041_v10, %v2636_v23  ;;  %v1668_v2 = vpop.f32.mrb[13].mxu0 }
 0x73a   : > { %v1044_v3 = vpop.f32.mrb[14].mxu0 }
 0x73b   : > { %1869 = vtanh.f32 %v1047_v1  ;;  %v1669_v4 = vpop.f32.mrb[15].mxu0  ;;  %v1048_v13 = vmul.f32 0.5, %v1047_v1 }
 0x73c   : > { %v1113_v5 = vpop.f32.mrb[12].mxu1 }
 0x73d   : > { %v1119_v6 = vadd.f32 %v1113_v5, %v2646_v35  ;;  %v1676_v12 = vpop.f32.mrb[13].mxu1 }
 0x73e   : > { %v1116_v7 = vpop.f32.mrb[14].mxu1 }
 0x73f   : > { %1871 = vtanh.f32 %v1119_v6  ;;  %v1677_v11 = vpop.f32.mrb[15].mxu1  ;;  %v1120_v23 = vmul.f32 0.5, %v1119_v6 }
 0x740   : > { %1873 = vtanh.f32 %v1048_v13 }
 0x741   : > { %1875 = vtanh.f32 %v1120_v23 }
 0x745   : > { %v1870_v8 = vpop.eup %1869 }
 0x746   : > { %1055 = vrot.lane.b32.xlu0 %v1870_v8, %s2186_s16 }
 0x749   : > { %v1872_v9 = vpop.eup %1871 }
 0x74a   : > { %1127 = vrot.lane.b32.xlu1 %v1872_v9, %s2186_s16  ;;  %v1874_v14 = vpop.eup %1873 }
 0x74b   : > { %v1050_v15 = vmul.f32 0.5, %v1874_v14  ;;  %v1876_v16 = vpop.eup %1875 }
 0x74c   : > { %v1122_v18 = vmul.f32 0.5, %v1876_v16  ;;  %v2190_v16 = vmov (!%p1564_p0), 0.0  }
 0x74d   : > { %v1051_v17 = vadd.f32 0.5, %v1050_v15  ;;  %1694 = vmatprep.subr.bf16.mxu0 (!%p1564_p0), %v2190_v16 }
 0x74e   : > { %v1123_v20 = vadd.f32 0.5, %v1122_v18  ;;  %v1894_v18 = vld [vmem:[#allocation17 + $0x8] sm:$0xff] (!%p1564_p0)  }
 0x74f   : > { %v1053_v24 = vmul.f32 %v1051_v17, %v919_v51 }
 0x750   : > { %v1125_v28 = vmul.f32 %v1123_v20, %v991_v54 }
 0x7b8   : > { %v1056_v35 = vpop.permute.xlu0 %1055 }
 0x7b9   : > { %v1058_v19 = vmul.f32 %v1056_v35, %v1051_v17  ;;  %v1895_v35 = vld [vmem:[#allocation17 + $0x10] sm:$0xff] (!%p1564_p0)  }
 0x7bb   : > { %1060 = vrot.lane.b32.xlu0 %v1058_v19, %s2186_s16  ;;  %v1896_v19 = vld [vmem:[#allocation17 + $0x18] sm:$0xff] (!%p1564_p0)  }
 0x7bc   : > { %v1128_v21 = vpop.permute.xlu1 %1127 }
 0x7bd   : > { %v1130_v22 = vmul.f32 %v1128_v21, %v1123_v20 }
 0x7bf   : > { %1132 = vrot.lane.b32.xlu1 %v1130_v22, %s2186_s16 }
 0x82d   : > { %v1061_v25 = vpop.permute.xlu0 %1060 }
 0x82e   : > { %v1063_v26 = vadd.f32 %v1061_v25, %v1053_v24  ;;  %v1565_v25 = vld [vmem:[%s2823_s13] ss:$0 sm:$0xff] (!%p1564_p0) }
 0x830   : > { %1877 = vtanh.f32 %v1063_v26 }
 0x831   : > { %v1133_v30 = vpop.permute.xlu1 %1132 }
 0x832   : > { %v1135_v32 = vadd.f32 %v1133_v30, %v1125_v28 }
 0x834   : > { %1879 = vtanh.f32 %v1135_v32 }
 0x83a   : > { %v1878_v34 = vpop.eup %1877 }
 0x83b   : > { %1066 = vrot.lane.b32.xlu0 %v1878_v34, %s2186_s16 }
 0x83e   : > { %v1880_v36 = vpop.eup %1879 }
 0x83f   : > { %1138 = vrot.lane.b32.xlu1 %v1880_v36, %s2186_s16 }
 0x8ad   : > { %v1067_v37 = vpop.permute.xlu0 %1066 }
 0x8ae   : > { %v1069_v38 = vmul.f32 %v1067_v37, %v1051_v17  ;;  %v1893_v17 = vld [vmem:[#allocation17] sm:$0xff] (!%p1564_p0)  }
 0x8b0   : > { %v1144_v39 = vpack.c.bf16 %v1069_v38, %v1069_v38 }
 0x8b1   : > { %v1139_v33 = vpop.permute.xlu1 %1138 }
 0x8b2   : > { %v1141_v40 = vmul.f32 %v1139_v33, %v1123_v20  ;;  %1146 = vrot.lane.b32.xlu0 %v1144_v39, %s2187_s7 }
 0x8b4   : > { %v1215_v41 = vpack.c.bf16 %v1141_v40, %v1141_v40 }
 0x8b6   : > { %1217 = vrot.lane.b32.xlu1 %v1215_v41, %s2187_s7 }
 0x924   : > { %v1147_v42 = vpop.permute.xlu0 %1146 }
 0x925   : > { %1683 = vmatmul.mubr.msk.bf16.vlgmr.msra.gmra.mrb[16].mxu0 %vm517_vm1, %v1147_v42 }
 0x926   : > { %1702 = vmatprep.mubr.msk.bf16.mxu0 (!%p1564_p0), %vm2191_vm3, %v2190_v16  ;;  %1695 = vmatpush3.bf16.msra.mxu0 (!%p1564_p0), %v1893_v17 }
 0x927   : > { %1696 = vmatprep.subr.bf16.mxu0 (!%p1564_p0), %v2190_v16 }
 0x928   : > { %v1218_v43 = vpop.permute.xlu1 %1217 }
 0x929   : > { %1691 = vmatmul.mubr.msk.bf16.vlgmr.msra.gmra.mrb[16].mxu1 %vm517_vm1, %v1218_v43 }
 0x92a   : > { %1697 = vmatpush3.bf16.msra.mxu0 (!%p1564_p0), %v1894_v18 }
 0x92b   : > { %1698 = vmatprep.subr.bf16.mxu0 (!%p1564_p0), %v2190_v16 }
 0x92e   : > { %1699 = vmatpush3.bf16.msra.mxu0 (!%p1564_p0), %v1895_v35 }
 0x92f   : > { %1700 = vmatprep.subr.bf16.mxu0 (!%p1564_p0), %v2190_v16 }
 0x932   : > { %1701 = vmatpush3.bf16.msra.mxu0 (!%p1564_p0), %v1896_v19 }
 0x9f8   : > { %v1185_v44 = vpop.f32.mrb[16].mxu0 }
 0x9f9   : > { %v1191_v27 = vadd.f32 %v1185_v44, %v2640_v29  ;;  %v1684_v45 = vpop.f32.mrb[17].mxu0 }
 0x9fa   : > { %v1188_v46 = vpop.f32.mrb[18].mxu0 }
 0x9fb   : > { %1881 = vtanh.f32 %v1191_v27  ;;  %v1685_v47 = vpop.f32.mrb[19].mxu0  ;;  %v1192_v55 = vmul.f32 0.5, %v1191_v27 }
 0x9fc   : > { %v1256_v48 = vpop.f32.mrb[16].mxu1 }
 0x9fd   : > { %v1262_v49 = vadd.f32 %v1256_v48, %v2642_v31  ;;  %v1692_v50 = vpop.f32.mrb[17].mxu1 }
 0x9fe   : > { %v1259_v51 = vpop.f32.mrb[18].mxu1 }
 0x9ff   : > { %1883 = vtanh.f32 %v1262_v49  ;;  %v1693_v52 = vpop.f32.mrb[19].mxu1  ;;  %v1263_v29 = vmul.f32 0.5, %v1262_v49 }
 0xa00   : > { %1885 = vtanh.f32 %v1192_v55 }
 0xa01   : > { %1887 = vtanh.f32 %v1263_v29 }
 0xa05   : > { %v1882_v53 = vpop.eup %1881 }
 0xa06   : > { %1199 = vrot.lane.b32.xlu0 %v1882_v53, %s2186_s16 }
 0xa09   : > { %v1884_v54 = vpop.eup %1883 }
 0xa0a   : > { %1270 = vrot.lane.b32.xlu1 %v1884_v54, %s2186_s16  ;;  %v1886_v56 = vpop.eup %1885 }
 0xa0b   : > { %v1194_v57 = vmul.f32 0.5, %v1886_v56  ;;  %v1888_v58 = vpop.eup %1887 }
 0xa0c   : > { %v1265_v60 = vmul.f32 0.5, %v1888_v58 }
 0xa0d   : > { %v1195_v59 = vadd.f32 0.5, %v1194_v57 }
 0xa0e   : > { %v1266_v62 = vadd.f32 0.5, %v1265_v60 }
 0xa0f   : > { %v1197_v10 = vmul.f32 %v1195_v59, %v1063_v26 }
 0xa10   : > { %v1268_v3 = vmul.f32 %v1266_v62, %v1135_v32 }
 0xa78   : > { %v1200_v31 = vpop.permute.xlu0 %1199 }
 0xa79   : > { %v1202_v61 = vmul.f32 %v1200_v31, %v1195_v59 }
 0xa7b   : > { %1204 = vrot.lane.b32.xlu0 %v1202_v61, %s2186_s16 }
 0xa7c   : > { %v1271_v63 = vpop.permute.xlu1 %1270 }
 0xa7d   : > { %v1273_v0 = vmul.f32 %v1271_v63, %v1266_v62 }
 0xa7f   : > { %1275 = vrot.lane.b32.xlu1 %v1273_v0, %s2186_s16 }
 0xaed   : > { %v1205_v1 = vpop.permute.xlu0 %1204 }
 0xaee   : > { %v1207_v2 = vadd.f32 %v1205_v1, %v1197_v10 }
 0xaf0   : > { %1889 = vtanh.f32 %v1207_v2 }
 0xaf1   : > { %v1276_v4 = vpop.permute.xlu1 %1275 }
 0xaf2   : > { %v1278_v5 = vadd.f32 %v1276_v4, %v1268_v3 }
 0xaf4   : > { %1891 = vtanh.f32 %v1278_v5 }
 0xafa   : > { %v1890_v6 = vpop.eup %1889 }
 0xafb   : > { %1210 = vrot.lane.b32.xlu0 %v1890_v6, %s2186_s16 }
 0xafe   : > { %v1892_v12 = vpop.eup %1891 }
 0xaff   : > { %1281 = vrot.lane.b32.xlu1 %v1892_v12, %s2186_s16 }
 0xb03   : > { %1291 = vrot.lane.b32.xlu1 %v1207_v2, %s2188_s11 }
 0xb07   : > { %1301 = vrot.lane.b32.xlu1 %v1278_v5, %s2188_s11 }
 0xb6d   : > { %v1211_v7 = vpop.permute.xlu0 %1210 }
 0xb6e   : > { %v1213_v11 = vmul.f32 %v1211_v7, %v1195_v59 }
 0xb70   : > { %1286 = vrot.lane.b32.xlu0 %v1213_v11, %s2187_s7 }
 0xb71   : > { %v1282_v8 = vpop.permute.xlu1 %1281 }
 0xb72   : > { %v1284_v9 = vmul.f32 %v1282_v8, %v1266_v62 }
 0xb74   : > { %1296 = vrot.lane.b32.xlu0 %v1284_v9, %s2187_s7 }
 0xb75   : > { %v1292_v13 = vpop.permute.xlu1 %1291 }
 0xb76   : > { %1294 = vst.msk [vmem:[#allocation5] sm:$0xff] %vm517_vm1, %v1292_v13 }
 0xb78   : > { %1309 = vrot.lane.b32.xlu0 (!%p1564_p0), %v1284_v9, %s2189_s12 }
 0xb79   : > { %v1302_v23 = vpop.permute.xlu1 %1301 }
 0xb7a   : > { %1304 = vst.msk [vmem:[#allocation7] sm:$0xff] %vm517_vm1, %v1302_v23 }
 0xbe1   : > { %1308 = sbr.rel (%p1564_p0) target bundleno = 3271 (0xcc7), region = 92 }
 0xbe2   : > { %v1287_v14 = vpop.permute.xlu0 %1286 }
 0xbe3   : > { %1289 = vst.msk [vmem:[#allocation4] sm:$0xff] %vm517_vm1, %v1287_v14 }
 0xbe6   : > { %v1297_v15 = vpop.permute.xlu0 %1296 }
 0xbe7   : > { %1299 = vst.msk [vmem:[#allocation6] sm:$0xff] %vm517_vm1, %v1297_v15 }
 0xbea   : > { %v1310_v20 = vpop.permute.xlu0 %1309 }
 0xbeb   : > { %v1312_v21 = vsel %vm517_vm1, %v1287_v14, %v1310_v20 }
 0xbec   : > { %v1313_v22 = vmax.f32 %v1312_v21, 0.0 }
 0xbee   : > { %v1314_v24 = vpack.c.bf16 %v1313_v22, %v1313_v22 }
 0xbf0   : > { %1703 = vmatmul.mubr.msk.bf16.vlgmr.msra.gmra.mrb[0].mxu0 %vm1354_vm4, %v1314_v24 }
 0xcc3   : > { %v1392_v26 = vpop.f32.mrb[0].mxu0 }
 0xcc4   : > { %v1393_v28 = vadd.f32 %v1565_v25, %v1392_v26  ;;  %v1704_v30 = vpop.f32.mrb[1].mxu0 }
 0xcc5   : > { %v1395_v32 = vpop.f32.mrb[2].mxu0 }
 0xcc6   : > { %1398 = vst [vmem:[#allocation19] sm:$0xff] %v1393_v28  ;;  %v1705_v34 = vpop.f32.mrb[3].mxu0 }
 0xcc7 PF: > { %p1759_p9 = scmp.eq.s32.totalorder %s2282_s20, 1  ;;  %s2192_s21 = smov [#allocation19]  }
 0xcc8   : > { %s1406_s6 = sshll.u32 %s2192_s21, 4  ;;  %s1407_s6 = int_to_ptr.vmem [resolvable:$true] %s1406_s6 }
 0xcc9   : > { %s2069_s27 = scalar_lea.vmem %s1407_s6, 128  ;;  %p2076_p3 = scmp.lt.s32.totalorder %s1407_s6, %s1407_s6 }
 0xcca   : > { %p2070_p4 = scmp.ne.s32.totalorder %s1407_s6, %s2069_s27  ;;  %p2077_p13 = scmp.lt.s32.totalorder %s2069_s27, %s2069_s27 }
 0xccc   : > { %p2071_p10 = pnand %p2070_p4, %p1759_p9  ;;  %p2078_p1 = por %p2077_p13, %p2076_p3 }
 0xcce   : > { %p2072_p5 = pneg %p2071_p10 }
 0xcd0   : > { %p2079_p2 = pnand %p2078_p1, %p2072_p5 }
 0xcd2   : > { %2082 = shalt.err (!%p2079_p2)
}
 0xcd3   : > { %s2824_s29 = sld [smem:[#allocation31_spill]] }
 0xcd9   : > { %s2083_s10 = scalar_lea.hbm %s2824_s29, 128 }
 0xcda   : > { %p2084_p12 = scmp.ne.s32.totalorder %s2824_s29, %s2083_s10  ;;  %p2089_p6 = scmp.lt.u32.totalorder %s2083_s10, %s2824_s29 }
 0xcdc   : > { %p2085_p7 = pnand %p2084_p12, %p1759_p9 }
 0xcde   : > { %p2086_p11 = pneg %p2085_p7 }
 0xce0   : > { %p2091_p8 = pnand %p2089_p6, %p2086_p11 }
 0xce2   : > { %2094 = shalt.err (!%p2091_p8)
}
 0xce3   : > { %1727 = dma.vmem_to_hbm [thread:$0]  (%p1759_p9), %s1407_s6, 128, %s2824_s29, [#allocation10]  }
 0xce4   : > { %2144 = dma.done.wait (%p1759_p9), [#allocation10], 128  }
 0xce5   : > { %2146 = vsyncadd (%p1759_p9), [#allocation10], 4294967168 }
 0xce6 PF: > { %p26_p0 = scmp.ge.s32.totalorder %s2445_s24, 4   ;;  %s2825_s13 = smov %s2153_s14 }
 0xce7   : > { %s2826_s14 = smov %s2157_s15  ;;  %s2827_s15 = smov %s2493_s9 }
 0xce8   : > { %s2828_s16 = smov %s2165_s17  ;;  %s2829_s17 = smov %s2169_s18 }
 0xce9   : > { %s2830_s18 = smov %s2486_s25  ;;  %s2831_s19 = smov %s2445_s24 }
 0xcea   :  { %28 = sbr.rel (!%p26_p0) target bundleno = 17 (0x11), region = 140 }
 0xcf1   :  { %1419 = vsyncpa [#allocation9], 1 }
 0xcf2   :  { %1421 = vsyncpa [#allocation9 + $0x1], 1 }
 0xcf3   :  { %1422 = vsyncpa [#allocation12], 1 }
 0xcf4   :  { %1424 = vsyncpa [#allocation12 + $0x1], 1 }
 0xcf5   :  { %1425 = vsyncpa [#allocation15], 1 }
 0xcf6   :  { %1426 = vsyncpa [#allocation18], 1 }
 0xcf7   :  { %1427 = vsyncpa [#allocation10], 1 }
 0xcf8   :  { %1429 = vsyncpa [#allocation10 + $0x1], 1 }

</bundles_post_ra>
